<compile_context>
chip_gen: v5e
topology: v5e:2x2
jax: 0.10.0
libtpu: 0.0.40
codegen_flags: <defaults>
</compile_context>

<pallas_src>
import functools

import jax
import jax.numpy as jnp
from jax.experimental import pallas as pl
from jax.experimental.pallas import tpu as pltpu

NEG_SLOPE = 0.2       # GATConv default negative_slope
MASK_NEG = -1e30      # additive mask value for non-edges (f32-safe sentinel)


def _elu(v):
    # F.elu (dropout = identity in eval).  exp(x)-1 stays within the guaranteed Mosaic
    # elementwise set; self loops guarantee no fully-masked softmax row upstream.
    # TODO(synk): expm1 would be exact near 0 but is not in the guaranteed Mosaic lowering set.
    return jnp.where(v > 0, v, jnp.exp(v) - 1.0)


# ------------------------------ single fused forward kernel ------------------------------

def _gat_fused_kernel(*refs, num_layers, num_heads, out_ch, tgt_sizes, num_links,
                      negative_slope):
    """transform_lin + num_layers x (GATConv(concat=False) + elu) + endpoint gather + MLP head.

    refs = (idx0[SMEM], idx1[SMEM], x0, w_pre,
            *(Wl_t, att_sel, bias, mask_bias) per layer,
            w1a, w1b, w2, out, x_scratch, g0_scratch, g1_scratch)
      x0        [Ns0, Din]    gathered input features init_mat[n_id]
      w_pre     [Din, C]      transform_lin weight (bias=False), fused here
      Wl_t      [C, H*C]      shared lin_l == lin_r weight (transposed), lane-dense
      att_sel   [H*C, 2H]     block-diag selectors: cols [:H] -> alpha_r, cols [H:] -> alpha_l
      bias      [1, C]        GATConv bias (concat=False)
      mask_bias [Nt, Ns]      additive adjacency bias: 0 on edges (incl. self loops), -1e30 else
      w1a, w1b  [C, C]        lin1 weight split over the [x_u | x_v] concat
      w2        [C, out]      lin2 weight
      out       [L, out]
    """
    H, C, L = num_heads, out_ch, num_links
    idx0_ref, idx1_ref, x0_ref, wpre_ref = refs[:4]
    layer_refs = refs[4:4 + 4 * num_layers]
    (w1a_ref, w1b_ref, w2_ref, o_ref,
     x_sc, g0_sc, g1_sc) = refs[4 + 4 * num_layers:]

    def gat_conv(x, wl_t, att_sel, bias, mask_bias, nt):
        # shared per-head projection, kept lane-dense as [Ns, H*C]
        xl = jnp.dot(x, wl_t, preferred_element_type=jnp.float32)
        # ONE combined selector matmul: columns [:H] = alpha_r, columns [H:] = alpha_l
        arl = jnp.dot(xl, att_sel, preferred_element_type=jnp.float32)        # [Ns, 2H]
        ar = arl[:nt, :H]                                                     # [Nt, H] (targets only)
        alT = arl[:, H:].T                                                    # [H, Ns] small transpose
        ps = []
        for h in range(H):                                   # static unroll (H = 8)
            lg = ar[:, h:h + 1] + alT[h:h + 1, :]            # alpha_i + alpha_j -> [Nt, Ns]
            lg = jnp.maximum(lg, negative_slope * lg)        # leaky_relu (vmul + vmax)
            lg = lg + mask_bias                              # softmax restricted to edges + self loops
            m = jnp.max(lg, axis=-1, keepdims=True)
            e = jnp.exp(lg - m)
            denom = jnp.sum(e, axis=-1, keepdims=True)
            ps.append(e * pl.reciprocal(denom))              # exact reciprocal (eval precision)
        # merged aggregation: one wide-K matmul instead of H small (K=Ns, N=C) matmuls
        p_cat = jnp.concatenate(ps, axis=-1)                                         # [Nt, H*Ns]
        xl_stk = jnp.concatenate([xl[:, h * C:(h + 1) * C] for h in range(H)], axis=0)  # [H*Ns, C]
        out = jnp.dot(p_cat, xl_stk, preferred_element_type=jnp.float32) * (1.0 / H) + bias
        return _elu(out)

    # fused transform_lin (bias=False); the row gather by n_id commutes with it and stays outside.
    x = jnp.dot(x0_ref[...], wpre_ref[...], preferred_element_type=jnp.float32)
    for i in range(num_layers):
        wl_ref, sel_ref, bias_ref, mask_ref = layer_refs[4 * i:4 * i + 4]
        x = gat_conv(x, wl_ref[...], sel_ref[...], bias_ref[...], mask_ref[...], tgt_sizes[i])

    # link-endpoint gather: SMEM row indices -> dynamic sublane reads from the VMEM result
    x_sc[...] = x
    for l in range(L):                                       # static unroll (L tiny)
        g0_sc[pl.ds(l, 1), :] = x_sc[pl.ds(idx0_ref[l], 1), :]
        g1_sc[pl.ds(l, 1), :] = x_sc[pl.ds(idx1_ref[l], 1), :]

    # MLP head: lin1 over [x_u | x_v] split into two matmuls (no concat buffer), ELU, lin2.
    h1 = (jnp.dot(g0_sc[...], w1a_ref[...], preferred_element_type=jnp.float32)
          + jnp.dot(g1_sc[...], w1b_ref[...], preferred_element_type=jnp.float32))
    h1 = _elu(h1)
    o_ref[...] = jnp.dot(h1, w2_ref[...], preferred_element_type=jnp.float32)


# ------------------------------ forward pass (one kernel + thin glue) ------------------------------

def gat_forward(params, init_mat, adjs, link, n_id, *, num_heads, hidden):
    H, C = num_heads, hidden
    num_layers = len(adjs)
    L = int(link.shape[0])
    tgt_sizes = tuple(int(mask.shape[0]) for mask, _ in adjs)

    # Thin XLA glue: feature row gather (commutes with the fused transform_lin) and the first-match
    # endpoint index lookup (torch.where(n_id == v)[0][0] equivalent; n_id entries are unique).
    x0 = init_mat[n_id]
    idx0 = jnp.argmax(n_id[None, :] == link[:, 0][:, None], axis=1).astype(jnp.int32)
    idx1 = jnp.argmax(n_id[None, :] == link[:, 1][:, None], axis=1).astype(jnp.int32)

    args = [idx0, idx1, x0, params["transform_w_t"]]
    for i, (mask_bias, _size) in enumerate(adjs):
        cp = params["convs"][i]
        args += [cp["Wl_t"], cp["att_sel"], cp["bias"], mask_bias]
    args += [params["lin1_wa_t"], params["lin1_wb_t"], params["lin2_w_t"]]

    out_ch = int(params["lin2_w_t"].shape[1])

    # Advisory cost estimate so XLA schedules the surrounding glue around the custom call.
    flops = 2 * int(x0.shape[0]) * int(x0.shape[1]) * C
    transcendentals = 0
    for mask_bias, _size in adjs:
        nt, ns = int(mask_bias.shape[0]), int(mask_bias.shape[1])
        flops += 2 * ns * C * (H * C) + 2 * ns * (H * C) * (2 * H) + 2 * nt * (H * ns) * C
        flops += 10 * H * nt * ns
        transcendentals += H * nt * ns + nt * C
    flops += 2 * L * (2 * C) * C + 2 * L * C * out_ch
    transcendentals += L * C
    bytes_accessed = sum(int(a.size) * int(a.dtype.itemsize) for a in args) + L * out_ch * 4

    smem = pl.BlockSpec(memory_space=pltpu.MemorySpace.SMEM)
    vmem = pl.BlockSpec(memory_space=pltpu.MemorySpace.VMEM)   # whole (tiny) arrays resident in VMEM

    out = pl.pallas_call(
        functools.partial(_gat_fused_kernel, num_layers=num_layers, num_heads=H,
                          out_ch=C, tgt_sizes=tgt_sizes, num_links=L,
                          negative_slope=NEG_SLOPE),
        out_shape=jax.ShapeDtypeStruct((L, out_ch), jnp.float32),
        in_specs=[smem, smem] + [vmem] * (len(args) - 2),
        out_specs=vmem,
        scratch_shapes=[pltpu.VMEM((tgt_sizes[-1], C), jnp.float32),   # final layer output (gather src)
                        pltpu.VMEM((L, C), jnp.float32),               # gathered endpoint-u rows
                        pltpu.VMEM((L, C), jnp.float32)],              # gathered endpoint-v rows
        cost_estimate=pl.CostEstimate(flops=flops, transcendentals=transcendentals,
                                      bytes_accessed=bytes_accessed),
    )(*args)
    return out[:, 0]                                           # squeeze(1)


# ------------------------------ deterministic setup ------------------------------

def glorot(key, shape, fan_in, fan_out):
    limit = (6.0 / (fan_in + fan_out)) ** 0.5
    return jax.random.uniform(key, shape, jnp.float32, -limit, limit)


def build_attn_selector(att_l, att_r):
    """Block-diagonal selectors so per-head <xl_h, att_h> reductions become ONE lane-dense matmul.
    Columns [:H] give alpha_r, columns [H:] give alpha_l."""
    H, C = att_l.shape
    eye = jnp.eye(H, dtype=jnp.float32)
    sel_r = (att_r[:, :, None] * eye[:, None, :]).reshape(H * C, H)
    sel_l = (att_l[:, :, None] * eye[:, None, :]).reshape(H * C, H)
    return jnp.concatenate([sel_r, sel_l], axis=1)             # [H*C, 2H]


def make_mask_bias(key, Ns, Nt, num_edges):
    """Additive adjacency bias [Nt, Ns]: 0 where edge j->i (incl. self loops for i<Nt), -1e30 else."""
    ks, kt = jax.random.split(key)
    src = jax.random.randint(ks, (num_edges,), 0, Ns)
    tgt = jax.random.randint(kt, (num_edges,), 0, Nt)
    mask = jnp.zeros((Nt, Ns), jnp.float32).at[tgt, src].set(1.0)
    mask = mask.at[jnp.arange(Nt), jnp.arange(Nt)].set(1.0)    # add_self_loops
    return jnp.where(mask > 0, 0.0, MASK_NEG).astype(jnp.float32)


if __name__ == "__main__":
    in_channels, hidden, out_channels = 16, 32, 1
    num_layers, num_heads = 2, 8
    C = hidden                               # GATConv out_channels == hidden (concat=False)
    N_total = 20
    sizes = [(16, 12), (12, 8)]              # (num_src, num_tgt) per sampled layer
    num_links = 3

    key = jax.random.PRNGKey(0)
    ks = jax.random.split(key, 16)

    lin1_w_t = glorot(ks[1], (2 * hidden, hidden), 2 * hidden, hidden)
    params = {
        "transform_w_t": glorot(ks[0], (in_channels, hidden), in_channels, hidden),
        "convs": [],
        "lin1_wa_t": lin1_w_t[:hidden, :],   # lin1 weight split over the [x_u | x_v] concat
        "lin1_wb_t": lin1_w_t[hidden:, :],
        "lin2_w_t": glorot(ks[2], (hidden, out_channels), hidden, out_channels),
    }
    for layer in range(num_layers):
        kw, ka, kb = jax.random.split(ks[3 + layer], 3)
        att_l = glorot(ka, (num_heads, C), num_heads, C)
        att_r = glorot(kb, (num_heads, C), num_heads, C)
        params["convs"].append({
            "Wl_t": glorot(kw, (hidden, num_heads * C), hidden, num_heads * C),
            "att_sel": build_attn_selector(att_l, att_r),
            "bias": jnp.zeros((1, C), jnp.float32),            # zeros() init, as in reset_parameters
        })

    init_mat = jax.random.normal(ks[8], (N_total, in_channels), jnp.float32)
    n_id = jax.random.permutation(ks[9], N_total)[: sizes[0][0]].astype(jnp.int32)  # 16 sampled ids
    adjs = [
        (make_mask_bias(ks[10], sizes[0][0], sizes[0][1], 40), sizes[0]),
        (make_mask_bias(ks[11], sizes[1][0], sizes[1][1], 24), sizes[1]),
    ]
    # link endpoints chosen among the seed nodes (first rows of the final layer output)
    link = jnp.stack([n_id[jnp.array([0, 1, 2])], n_id[jnp.array([3, 4, 5])]], axis=1)

    fwd = jax.jit(functools.partial(gat_forward, num_heads=num_heads, hidden=hidden))
    out = fwd(params, init_mat, adjs, link, n_id)
    jax.block_until_ready(out)
    assert out.shape == (num_links,)
    print("KERNEL_OK")
</pallas_src>

<mosaic_0001>
module attributes {stable_mosaic.version = 11 : i64} {
  func.func @_gat_fused_kernel(%arg0: memref<3xi32, #tpu.memory_space<smem>>, %arg1: memref<3xi32, #tpu.memory_space<smem>>, %arg2: memref<16x16xf32, #tpu.memory_space<vmem>>, %arg3: memref<16x32xf32, #tpu.memory_space<vmem>>, %arg4: memref<32x256xf32, #tpu.memory_space<vmem>>, %arg5: memref<256x16xf32, #tpu.memory_space<vmem>>, %arg6: memref<1x32xf32, #tpu.memory_space<vmem>>, %arg7: memref<12x16xf32, #tpu.memory_space<vmem>>, %arg8: memref<32x256xf32, #tpu.memory_space<vmem>>, %arg9: memref<256x16xf32, #tpu.memory_space<vmem>>, %arg10: memref<1x32xf32, #tpu.memory_space<vmem>>, %arg11: memref<8x12xf32, #tpu.memory_space<vmem>>, %arg12: memref<32x32xf32, #tpu.memory_space<vmem>>, %arg13: memref<32x32xf32, #tpu.memory_space<vmem>>, %arg14: memref<32x1xf32, #tpu.memory_space<vmem>>, %arg15: memref<3x1xf32, #tpu.memory_space<vmem>>, %arg16: memref<8x32xf32, #tpu.memory_space<vmem>>, %arg17: memref<3x32xf32, #tpu.memory_space<vmem>>, %arg18: memref<3x32xf32, #tpu.memory_space<vmem>>) attributes {dimension_semantics = [], scalar_prefetch = 0 : i64, scratch_operands = 3 : i64, tpu.core_type = #tpu.core_type<tc>} {
    %c0 = arith.constant 0 : index
    %c0_0 = arith.constant 0 : index
    %0 = vector.load %arg2[%c0, %c0_0] : memref<16x16xf32, #tpu.memory_space<vmem>>, vector<16x16xf32>
    %c0_1 = arith.constant 0 : index
    %c0_2 = arith.constant 0 : index
    %1 = vector.load %arg3[%c0_1, %c0_2] : memref<16x32xf32, #tpu.memory_space<vmem>>, vector<16x32xf32>
    %cst = arith.constant dense<0.000000e+00> : vector<16x32xf32>
    %2 = tpu.matmul %0, %1, %cst {dimension_numbers = #tpu.dot_dimension_numbers<[1], [0], [0], [1], [0, 0, 1, 1], [], []>} : vector<16x16xf32>, vector<16x32xf32>, vector<16x32xf32> -> vector<16x32xf32>
    %c0_3 = arith.constant 0 : index
    %c0_4 = arith.constant 0 : index
    %3 = vector.load %arg4[%c0_3, %c0_4] : memref<32x256xf32, #tpu.memory_space<vmem>>, vector<32x256xf32>
    %c0_5 = arith.constant 0 : index
    %c0_6 = arith.constant 0 : index
    %4 = vector.load %arg5[%c0_5, %c0_6] : memref<256x16xf32, #tpu.memory_space<vmem>>, vector<256x16xf32>
    %c0_7 = arith.constant 0 : index
    %c0_8 = arith.constant 0 : index
    %5 = vector.load %arg6[%c0_7, %c0_8] : memref<1x32xf32, #tpu.memory_space<vmem>>, vector<1x32xf32>
    %c0_9 = arith.constant 0 : index
    %c0_10 = arith.constant 0 : index
    %6 = vector.load %arg7[%c0_9, %c0_10] : memref<12x16xf32, #tpu.memory_space<vmem>>, vector<12x16xf32>
    %cst_11 = arith.constant dense<0.000000e+00> : vector<16x256xf32>
    %7 = tpu.matmul %2, %3, %cst_11 {dimension_numbers = #tpu.dot_dimension_numbers<[1], [0], [0], [1], [0, 0, 1, 1], [], []>} : vector<16x32xf32>, vector<32x256xf32>, vector<16x256xf32> -> vector<16x256xf32>
    %cst_12 = arith.constant dense<0.000000e+00> : vector<16x16xf32>
    %8 = tpu.matmul %7, %4, %cst_12 {dimension_numbers = #tpu.dot_dimension_numbers<[1], [0], [0], [1], [0, 0, 1, 1], [], []>} : vector<16x256xf32>, vector<256x16xf32>, vector<16x16xf32> -> vector<16x16xf32>
    %9 = vector.extract_strided_slice %8 {offsets = [0, 0], sizes = [12, 8], strides = [1, 1]} : vector<16x16xf32> to vector<12x8xf32>
    %10 = vector.extract_strided_slice %8 {offsets = [0, 8], sizes = [16, 8], strides = [1, 1]} : vector<16x16xf32> to vector<16x8xf32>
    %11 = tpu.transpose %10, [1, 0] : vector<16x8xf32> -> vector<8x16xf32>
    %12 = vector.extract_strided_slice %9 {offsets = [0, 0], sizes = [12, 1], strides = [1, 1]} : vector<12x8xf32> to vector<12x1xf32>
    %13 = vector.extract_strided_slice %11 {offsets = [0, 0], sizes = [1, 16], strides = [1, 1]} : vector<8x16xf32> to vector<1x16xf32>
    %14 = vector.broadcast %12 : vector<12x1xf32> to vector<12x16xf32>
    %15 = vector.broadcast %13 : vector<1x16xf32> to vector<12x16xf32>
    %16 = arith.addf %14, %15 : vector<12x16xf32>
    %cst_13 = arith.constant 2.000000e-01 : f32
    %17 = vector.broadcast %cst_13 : f32 to vector<12x16xf32>
    %18 = arith.mulf %17, %16 : vector<12x16xf32>
    %19 = arith.maximumf %16, %18 : vector<12x16xf32>
    %20 = arith.addf %19, %6 : vector<12x16xf32>
    %cst_14 = arith.constant dense<0xFF800000> : vector<12xf32>
    %21 = vector.multi_reduction <maximumf>, %20, %cst_14 [1] : vector<12x16xf32> to vector<12xf32>
    %22 = vector.shape_cast %21 : vector<12xf32> to vector<12x1xf32>
    %23 = vector.broadcast %22 : vector<12x1xf32> to vector<12x16xf32>
    %24 = arith.subf %20, %23 : vector<12x16xf32>
    %25 = math.exp %24 : vector<12x16xf32>
    %cst_15 = arith.constant dense<0.000000e+00> : vector<12xf32>
    %26 = vector.multi_reduction <add>, %25, %cst_15 [1] : vector<12x16xf32> to vector<12xf32>
    %27 = vector.shape_cast %26 : vector<12xf32> to vector<12x1xf32>
    %28 = tpu.reciprocal %27 : vector<12x1xf32> -> vector<12x1xf32>
    %29 = vector.broadcast %28 : vector<12x1xf32> to vector<12x16xf32>
    %30 = arith.mulf %25, %29 : vector<12x16xf32>
    %31 = vector.extract_strided_slice %9 {offsets = [0, 1], sizes = [12, 1], strides = [1, 1]} : vector<12x8xf32> to vector<12x1xf32>
    %32 = vector.extract_strided_slice %11 {offsets = [1, 0], sizes = [1, 16], strides = [1, 1]} : vector<8x16xf32> to vector<1x16xf32>
    %33 = vector.broadcast %31 : vector<12x1xf32> to vector<12x16xf32>
    %34 = vector.broadcast %32 : vector<1x16xf32> to vector<12x16xf32>
    %35 = arith.addf %33, %34 : vector<12x16xf32>
    %cst_16 = arith.constant 2.000000e-01 : f32
    %36 = vector.broadcast %cst_16 : f32 to vector<12x16xf32>
    %37 = arith.mulf %36, %35 : vector<12x16xf32>
    %38 = arith.maximumf %35, %37 : vector<12x16xf32>
    %39 = arith.addf %38, %6 : vector<12x16xf32>
    %cst_17 = arith.constant dense<0xFF800000> : vector<12xf32>
    %40 = vector.multi_reduction <maximumf>, %39, %cst_17 [1] : vector<12x16xf32> to vector<12xf32>
    %41 = vector.shape_cast %40 : vector<12xf32> to vector<12x1xf32>
    %42 = vector.broadcast %41 : vector<12x1xf32> to vector<12x16xf32>
    %43 = arith.subf %39, %42 : vector<12x16xf32>
    %44 = math.exp %43 : vector<12x16xf32>
    %cst_18 = arith.constant dense<0.000000e+00> : vector<12xf32>
    %45 = vector.multi_reduction <add>, %44, %cst_18 [1] : vector<12x16xf32> to vector<12xf32>
    %46 = vector.shape_cast %45 : vector<12xf32> to vector<12x1xf32>
    %47 = tpu.reciprocal %46 : vector<12x1xf32> -> vector<12x1xf32>
    %48 = vector.broadcast %47 : vector<12x1xf32> to vector<12x16xf32>
    %49 = arith.mulf %44, %48 : vector<12x16xf32>
    %50 = vector.extract_strided_slice %9 {offsets = [0, 2], sizes = [12, 1], strides = [1, 1]} : vector<12x8xf32> to vector<12x1xf32>
    %51 = vector.extract_strided_slice %11 {offsets = [2, 0], sizes = [1, 16], strides = [1, 1]} : vector<8x16xf32> to vector<1x16xf32>
    %52 = vector.broadcast %50 : vector<12x1xf32> to vector<12x16xf32>
    %53 = vector.broadcast %51 : vector<1x16xf32> to vector<12x16xf32>
    %54 = arith.addf %52, %53 : vector<12x16xf32>
    %cst_19 = arith.constant 2.000000e-01 : f32
    %55 = vector.broadcast %cst_19 : f32 to vector<12x16xf32>
    %56 = arith.mulf %55, %54 : vector<12x16xf32>
    %57 = arith.maximumf %54, %56 : vector<12x16xf32>
    %58 = arith.addf %57, %6 : vector<12x16xf32>
    %cst_20 = arith.constant dense<0xFF800000> : vector<12xf32>
    %59 = vector.multi_reduction <maximumf>, %58, %cst_20 [1] : vector<12x16xf32> to vector<12xf32>
    %60 = vector.shape_cast %59 : vector<12xf32> to vector<12x1xf32>
    %61 = vector.broadcast %60 : vector<12x1xf32> to vector<12x16xf32>
    %62 = arith.subf %58, %61 : vector<12x16xf32>
    %63 = math.exp %62 : vector<12x16xf32>
    %cst_21 = arith.constant dense<0.000000e+00> : vector<12xf32>
    %64 = vector.multi_reduction <add>, %63, %cst_21 [1] : vector<12x16xf32> to vector<12xf32>
    %65 = vector.shape_cast %64 : vector<12xf32> to vector<12x1xf32>
    %66 = tpu.reciprocal %65 : vector<12x1xf32> -> vector<12x1xf32>
    %67 = vector.broadcast %66 : vector<12x1xf32> to vector<12x16xf32>
    %68 = arith.mulf %63, %67 : vector<12x16xf32>
    %69 = vector.extract_strided_slice %9 {offsets = [0, 3], sizes = [12, 1], strides = [1, 1]} : vector<12x8xf32> to vector<12x1xf32>
    %70 = vector.extract_strided_slice %11 {offsets = [3, 0], sizes = [1, 16], strides = [1, 1]} : vector<8x16xf32> to vector<1x16xf32>
    %71 = vector.broadcast %69 : vector<12x1xf32> to vector<12x16xf32>
    %72 = vector.broadcast %70 : vector<1x16xf32> to vector<12x16xf32>
    %73 = arith.addf %71, %72 : vector<12x16xf32>
    %cst_22 = arith.constant 2.000000e-01 : f32
    %74 = vector.broadcast %cst_22 : f32 to vector<12x16xf32>
    %75 = arith.mulf %74, %73 : vector<12x16xf32>
    %76 = arith.maximumf %73, %75 : vector<12x16xf32>
    %77 = arith.addf %76, %6 : vector<12x16xf32>
    %cst_23 = arith.constant dense<0xFF800000> : vector<12xf32>
    %78 = vector.multi_reduction <maximumf>, %77, %cst_23 [1] : vector<12x16xf32> to vector<12xf32>
    %79 = vector.shape_cast %78 : vector<12xf32> to vector<12x1xf32>
    %80 = vector.broadcast %79 : vector<12x1xf32> to vector<12x16xf32>
    %81 = arith.subf %77, %80 : vector<12x16xf32>
    %82 = math.exp %81 : vector<12x16xf32>
    %cst_24 = arith.constant dense<0.000000e+00> : vector<12xf32>
    %83 = vector.multi_reduction <add>, %82, %cst_24 [1] : vector<12x16xf32> to vector<12xf32>
    %84 = vector.shape_cast %83 : vector<12xf32> to vector<12x1xf32>
    %85 = tpu.reciprocal %84 : vector<12x1xf32> -> vector<12x1xf32>
    %86 = vector.broadcast %85 : vector<12x1xf32> to vector<12x16xf32>
    %87 = arith.mulf %82, %86 : vector<12x16xf32>
    %88 = vector.extract_strided_slice %9 {offsets = [0, 4], sizes = [12, 1], strides = [1, 1]} : vector<12x8xf32> to vector<12x1xf32>
    %89 = vector.extract_strided_slice %11 {offsets = [4, 0], sizes = [1, 16], strides = [1, 1]} : vector<8x16xf32> to vector<1x16xf32>
    %90 = vector.broadcast %88 : vector<12x1xf32> to vector<12x16xf32>
    %91 = vector.broadcast %89 : vector<1x16xf32> to vector<12x16xf32>
    %92 = arith.addf %90, %91 : vector<12x16xf32>
    %cst_25 = arith.constant 2.000000e-01 : f32
    %93 = vector.broadcast %cst_25 : f32 to vector<12x16xf32>
    %94 = arith.mulf %93, %92 : vector<12x16xf32>
    %95 = arith.maximumf %92, %94 : vector<12x16xf32>
    %96 = arith.addf %95, %6 : vector<12x16xf32>
    %cst_26 = arith.constant dense<0xFF800000> : vector<12xf32>
    %97 = vector.multi_reduction <maximumf>, %96, %cst_26 [1] : vector<12x16xf32> to vector<12xf32>
    %98 = vector.shape_cast %97 : vector<12xf32> to vector<12x1xf32>
    %99 = vector.broadcast %98 : vector<12x1xf32> to vector<12x16xf32>
    %100 = arith.subf %96, %99 : vector<12x16xf32>
    %101 = math.exp %100 : vector<12x16xf32>
    %cst_27 = arith.constant dense<0.000000e+00> : vector<12xf32>
    %102 = vector.multi_reduction <add>, %101, %cst_27 [1] : vector<12x16xf32> to vector<12xf32>
    %103 = vector.shape_cast %102 : vector<12xf32> to vector<12x1xf32>
    %104 = tpu.reciprocal %103 : vector<12x1xf32> -> vector<12x1xf32>
    %105 = vector.broadcast %104 : vector<12x1xf32> to vector<12x16xf32>
    %106 = arith.mulf %101, %105 : vector<12x16xf32>
    %107 = vector.extract_strided_slice %9 {offsets = [0, 5], sizes = [12, 1], strides = [1, 1]} : vector<12x8xf32> to vector<12x1xf32>
    %108 = vector.extract_strided_slice %11 {offsets = [5, 0], sizes = [1, 16], strides = [1, 1]} : vector<8x16xf32> to vector<1x16xf32>
    %109 = vector.broadcast %107 : vector<12x1xf32> to vector<12x16xf32>
    %110 = vector.broadcast %108 : vector<1x16xf32> to vector<12x16xf32>
    %111 = arith.addf %109, %110 : vector<12x16xf32>
    %cst_28 = arith.constant 2.000000e-01 : f32
    %112 = vector.broadcast %cst_28 : f32 to vector<12x16xf32>
    %113 = arith.mulf %112, %111 : vector<12x16xf32>
    %114 = arith.maximumf %111, %113 : vector<12x16xf32>
    %115 = arith.addf %114, %6 : vector<12x16xf32>
    %cst_29 = arith.constant dense<0xFF800000> : vector<12xf32>
    %116 = vector.multi_reduction <maximumf>, %115, %cst_29 [1] : vector<12x16xf32> to vector<12xf32>
    %117 = vector.shape_cast %116 : vector<12xf32> to vector<12x1xf32>
    %118 = vector.broadcast %117 : vector<12x1xf32> to vector<12x16xf32>
    %119 = arith.subf %115, %118 : vector<12x16xf32>
    %120 = math.exp %119 : vector<12x16xf32>
    %cst_30 = arith.constant dense<0.000000e+00> : vector<12xf32>
    %121 = vector.multi_reduction <add>, %120, %cst_30 [1] : vector<12x16xf32> to vector<12xf32>
    %122 = vector.shape_cast %121 : vector<12xf32> to vector<12x1xf32>
    %123 = tpu.reciprocal %122 : vector<12x1xf32> -> vector<12x1xf32>
    %124 = vector.broadcast %123 : vector<12x1xf32> to vector<12x16xf32>
    %125 = arith.mulf %120, %124 : vector<12x16xf32>
    %126 = vector.extract_strided_slice %9 {offsets = [0, 6], sizes = [12, 1], strides = [1, 1]} : vector<12x8xf32> to vector<12x1xf32>
    %127 = vector.extract_strided_slice %11 {offsets = [6, 0], sizes = [1, 16], strides = [1, 1]} : vector<8x16xf32> to vector<1x16xf32>
    %128 = vector.broadcast %126 : vector<12x1xf32> to vector<12x16xf32>
    %129 = vector.broadcast %127 : vector<1x16xf32> to vector<12x16xf32>
    %130 = arith.addf %128, %129 : vector<12x16xf32>
    %cst_31 = arith.constant 2.000000e-01 : f32
    %131 = vector.broadcast %cst_31 : f32 to vector<12x16xf32>
    %132 = arith.mulf %131, %130 : vector<12x16xf32>
    %133 = arith.maximumf %130, %132 : vector<12x16xf32>
    %134 = arith.addf %133, %6 : vector<12x16xf32>
    %cst_32 = arith.constant dense<0xFF800000> : vector<12xf32>
    %135 = vector.multi_reduction <maximumf>, %134, %cst_32 [1] : vector<12x16xf32> to vector<12xf32>
    %136 = vector.shape_cast %135 : vector<12xf32> to vector<12x1xf32>
    %137 = vector.broadcast %136 : vector<12x1xf32> to vector<12x16xf32>
    %138 = arith.subf %134, %137 : vector<12x16xf32>
    %139 = math.exp %138 : vector<12x16xf32>
    %cst_33 = arith.constant dense<0.000000e+00> : vector<12xf32>
    %140 = vector.multi_reduction <add>, %139, %cst_33 [1] : vector<12x16xf32> to vector<12xf32>
    %141 = vector.shape_cast %140 : vector<12xf32> to vector<12x1xf32>
    %142 = tpu.reciprocal %141 : vector<12x1xf32> -> vector<12x1xf32>
    %143 = vector.broadcast %142 : vector<12x1xf32> to vector<12x16xf32>
    %144 = arith.mulf %139, %143 : vector<12x16xf32>
    %145 = vector.extract_strided_slice %9 {offsets = [0, 7], sizes = [12, 1], strides = [1, 1]} : vector<12x8xf32> to vector<12x1xf32>
    %146 = vector.extract_strided_slice %11 {offsets = [7, 0], sizes = [1, 16], strides = [1, 1]} : vector<8x16xf32> to vector<1x16xf32>
    %147 = vector.broadcast %145 : vector<12x1xf32> to vector<12x16xf32>
    %148 = vector.broadcast %146 : vector<1x16xf32> to vector<12x16xf32>
    %149 = arith.addf %147, %148 : vector<12x16xf32>
    %cst_34 = arith.constant 2.000000e-01 : f32
    %150 = vector.broadcast %cst_34 : f32 to vector<12x16xf32>
    %151 = arith.mulf %150, %149 : vector<12x16xf32>
    %152 = arith.maximumf %149, %151 : vector<12x16xf32>
    %153 = arith.addf %152, %6 : vector<12x16xf32>
    %cst_35 = arith.constant dense<0xFF800000> : vector<12xf32>
    %154 = vector.multi_reduction <maximumf>, %153, %cst_35 [1] : vector<12x16xf32> to vector<12xf32>
    %155 = vector.shape_cast %154 : vector<12xf32> to vector<12x1xf32>
    %156 = vector.broadcast %155 : vector<12x1xf32> to vector<12x16xf32>
    %157 = arith.subf %153, %156 : vector<12x16xf32>
    %158 = math.exp %157 : vector<12x16xf32>
    %cst_36 = arith.constant dense<0.000000e+00> : vector<12xf32>
    %159 = vector.multi_reduction <add>, %158, %cst_36 [1] : vector<12x16xf32> to vector<12xf32>
    %160 = vector.shape_cast %159 : vector<12xf32> to vector<12x1xf32>
    %161 = tpu.reciprocal %160 : vector<12x1xf32> -> vector<12x1xf32>
    %162 = vector.broadcast %161 : vector<12x1xf32> to vector<12x16xf32>
    %163 = arith.mulf %158, %162 : vector<12x16xf32>
    %164 = tpu.concatenate %30, %49, %68, %87, %106, %125, %144, %163 in 1 : vector<12x16xf32>, vector<12x16xf32>, vector<12x16xf32>, vector<12x16xf32>, vector<12x16xf32>, vector<12x16xf32>, vector<12x16xf32>, vector<12x16xf32> -> vector<12x128xf32>
    %165 = vector.extract_strided_slice %7 {offsets = [0, 0], sizes = [16, 32], strides = [1, 1]} : vector<16x256xf32> to vector<16x32xf32>
    %166 = vector.extract_strided_slice %7 {offsets = [0, 32], sizes = [16, 32], strides = [1, 1]} : vector<16x256xf32> to vector<16x32xf32>
    %167 = vector.extract_strided_slice %7 {offsets = [0, 64], sizes = [16, 32], strides = [1, 1]} : vector<16x256xf32> to vector<16x32xf32>
    %168 = vector.extract_strided_slice %7 {offsets = [0, 96], sizes = [16, 32], strides = [1, 1]} : vector<16x256xf32> to vector<16x32xf32>
    %169 = vector.extract_strided_slice %7 {offsets = [0, 128], sizes = [16, 32], strides = [1, 1]} : vector<16x256xf32> to vector<16x32xf32>
    %170 = vector.extract_strided_slice %7 {offsets = [0, 160], sizes = [16, 32], strides = [1, 1]} : vector<16x256xf32> to vector<16x32xf32>
    %171 = vector.extract_strided_slice %7 {offsets = [0, 192], sizes = [16, 32], strides = [1, 1]} : vector<16x256xf32> to vector<16x32xf32>
    %172 = vector.extract_strided_slice %7 {offsets = [0, 224], sizes = [16, 32], strides = [1, 1]} : vector<16x256xf32> to vector<16x32xf32>
    %173 = tpu.concatenate %165, %166, %167, %168, %169, %170, %171, %172 in 0 : vector<16x32xf32>, vector<16x32xf32>, vector<16x32xf32>, vector<16x32xf32>, vector<16x32xf32>, vector<16x32xf32>, vector<16x32xf32>, vector<16x32xf32> -> vector<128x32xf32>
    %cst_37 = arith.constant dense<0.000000e+00> : vector<12x32xf32>
    %174 = tpu.matmul %164, %173, %cst_37 {dimension_numbers = #tpu.dot_dimension_numbers<[1], [0], [0], [1], [0, 0, 1, 1], [], []>} : vector<12x128xf32>, vector<128x32xf32>, vector<12x32xf32> -> vector<12x32xf32>
    %cst_38 = arith.constant 1.250000e-01 : f32
    %175 = vector.broadcast %cst_38 : f32 to vector<12x32xf32>
    %176 = arith.mulf %174, %175 : vector<12x32xf32>
    %177 = vector.broadcast %5 : vector<1x32xf32> to vector<12x32xf32>
    %178 = arith.addf %176, %177 : vector<12x32xf32>
    %cst_39 = arith.constant 0.000000e+00 : f32
    %179 = vector.broadcast %cst_39 : f32 to vector<12x32xf32>
    %180 = arith.cmpf ogt, %178, %179 : vector<12x32xf32>
    %181 = math.exp %178 : vector<12x32xf32>
    %cst_40 = arith.constant 1.000000e+00 : f32
    %182 = vector.broadcast %cst_40 : f32 to vector<12x32xf32>
    %183 = arith.subf %181, %182 : vector<12x32xf32>
    %184 = arith.select %180, %178, %183 : vector<12x32xi1>, vector<12x32xf32>
    %c0_41 = arith.constant 0 : index
    %c0_42 = arith.constant 0 : index
    %185 = vector.load %arg8[%c0_41, %c0_42] : memref<32x256xf32, #tpu.memory_space<vmem>>, vector<32x256xf32>
    %c0_43 = arith.constant 0 : index
    %c0_44 = arith.constant 0 : index
    %186 = vector.load %arg9[%c0_43, %c0_44] : memref<256x16xf32, #tpu.memory_space<vmem>>, vector<256x16xf32>
    %c0_45 = arith.constant 0 : index
    %c0_46 = arith.constant 0 : index
    %187 = vector.load %arg10[%c0_45, %c0_46] : memref<1x32xf32, #tpu.memory_space<vmem>>, vector<1x32xf32>
    %c0_47 = arith.constant 0 : index
    %c0_48 = arith.constant 0 : index
    %188 = vector.load %arg11[%c0_47, %c0_48] : memref<8x12xf32, #tpu.memory_space<vmem>>, vector<8x12xf32>
    %cst_49 = arith.constant dense<0.000000e+00> : vector<12x256xf32>
    %189 = tpu.matmul %184, %185, %cst_49 {dimension_numbers = #tpu.dot_dimension_numbers<[1], [0], [0], [1], [0, 0, 1, 1], [], []>} : vector<12x32xf32>, vector<32x256xf32>, vector<12x256xf32> -> vector<12x256xf32>
    %cst_50 = arith.constant dense<0.000000e+00> : vector<12x16xf32>
    %190 = tpu.matmul %189, %186, %cst_50 {dimension_numbers = #tpu.dot_dimension_numbers<[1], [0], [0], [1], [0, 0, 1, 1], [], []>} : vector<12x256xf32>, vector<256x16xf32>, vector<12x16xf32> -> vector<12x16xf32>
    %191 = vector.extract_strided_slice %190 {offsets = [0, 0], sizes = [8, 8], strides = [1, 1]} : vector<12x16xf32> to vector<8x8xf32>
    %192 = vector.extract_strided_slice %190 {offsets = [0, 8], sizes = [12, 8], strides = [1, 1]} : vector<12x16xf32> to vector<12x8xf32>
    %193 = tpu.transpose %192, [1, 0] : vector<12x8xf32> -> vector<8x12xf32>
    %194 = vector.extract_strided_slice %191 {offsets = [0, 0], sizes = [8, 1], strides = [1, 1]} : vector<8x8xf32> to vector<8x1xf32>
    %195 = vector.extract_strided_slice %193 {offsets = [0, 0], sizes = [1, 12], strides = [1, 1]} : vector<8x12xf32> to vector<1x12xf32>
    %196 = vector.broadcast %194 : vector<8x1xf32> to vector<8x12xf32>
    %197 = vector.broadcast %195 : vector<1x12xf32> to vector<8x12xf32>
    %198 = arith.addf %196, %197 : vector<8x12xf32>
    %cst_51 = arith.constant 2.000000e-01 : f32
    %199 = vector.broadcast %cst_51 : f32 to vector<8x12xf32>
    %200 = arith.mulf %199, %198 : vector<8x12xf32>
    %201 = arith.maximumf %198, %200 : vector<8x12xf32>
    %202 = arith.addf %201, %188 : vector<8x12xf32>
    %cst_52 = arith.constant dense<0xFF800000> : vector<8xf32>
    %203 = vector.multi_reduction <maximumf>, %202, %cst_52 [1] : vector<8x12xf32> to vector<8xf32>
    %204 = vector.shape_cast %203 : vector<8xf32> to vector<8x1xf32>
    %205 = vector.broadcast %204 : vector<8x1xf32> to vector<8x12xf32>
    %206 = arith.subf %202, %205 : vector<8x12xf32>
    %207 = math.exp %206 : vector<8x12xf32>
    %cst_53 = arith.constant dense<0.000000e+00> : vector<8xf32>
    %208 = vector.multi_reduction <add>, %207, %cst_53 [1] : vector<8x12xf32> to vector<8xf32>
    %209 = vector.shape_cast %208 : vector<8xf32> to vector<8x1xf32>
    %210 = tpu.reciprocal %209 : vector<8x1xf32> -> vector<8x1xf32>
    %211 = vector.broadcast %210 : vector<8x1xf32> to vector<8x12xf32>
    %212 = arith.mulf %207, %211 : vector<8x12xf32>
    %213 = vector.extract_strided_slice %191 {offsets = [0, 1], sizes = [8, 1], strides = [1, 1]} : vector<8x8xf32> to vector<8x1xf32>
    %214 = vector.extract_strided_slice %193 {offsets = [1, 0], sizes = [1, 12], strides = [1, 1]} : vector<8x12xf32> to vector<1x12xf32>
    %215 = vector.broadcast %213 : vector<8x1xf32> to vector<8x12xf32>
    %216 = vector.broadcast %214 : vector<1x12xf32> to vector<8x12xf32>
    %217 = arith.addf %215, %216 : vector<8x12xf32>
    %cst_54 = arith.constant 2.000000e-01 : f32
    %218 = vector.broadcast %cst_54 : f32 to vector<8x12xf32>
    %219 = arith.mulf %218, %217 : vector<8x12xf32>
    %220 = arith.maximumf %217, %219 : vector<8x12xf32>
    %221 = arith.addf %220, %188 : vector<8x12xf32>
    %cst_55 = arith.constant dense<0xFF800000> : vector<8xf32>
    %222 = vector.multi_reduction <maximumf>, %221, %cst_55 [1] : vector<8x12xf32> to vector<8xf32>
    %223 = vector.shape_cast %222 : vector<8xf32> to vector<8x1xf32>
    %224 = vector.broadcast %223 : vector<8x1xf32> to vector<8x12xf32>
    %225 = arith.subf %221, %224 : vector<8x12xf32>
    %226 = math.exp %225 : vector<8x12xf32>
    %cst_56 = arith.constant dense<0.000000e+00> : vector<8xf32>
    %227 = vector.multi_reduction <add>, %226, %cst_56 [1] : vector<8x12xf32> to vector<8xf32>
    %228 = vector.shape_cast %227 : vector<8xf32> to vector<8x1xf32>
    %229 = tpu.reciprocal %228 : vector<8x1xf32> -> vector<8x1xf32>
    %230 = vector.broadcast %229 : vector<8x1xf32> to vector<8x12xf32>
    %231 = arith.mulf %226, %230 : vector<8x12xf32>
    %232 = vector.extract_strided_slice %191 {offsets = [0, 2], sizes = [8, 1], strides = [1, 1]} : vector<8x8xf32> to vector<8x1xf32>
    %233 = vector.extract_strided_slice %193 {offsets = [2, 0], sizes = [1, 12], strides = [1, 1]} : vector<8x12xf32> to vector<1x12xf32>
    %234 = vector.broadcast %232 : vector<8x1xf32> to vector<8x12xf32>
    %235 = vector.broadcast %233 : vector<1x12xf32> to vector<8x12xf32>
    %236 = arith.addf %234, %235 : vector<8x12xf32>
    %cst_57 = arith.constant 2.000000e-01 : f32
    %237 = vector.broadcast %cst_57 : f32 to vector<8x12xf32>
    %238 = arith.mulf %237, %236 : vector<8x12xf32>
    %239 = arith.maximumf %236, %238 : vector<8x12xf32>
    %240 = arith.addf %239, %188 : vector<8x12xf32>
    %cst_58 = arith.constant dense<0xFF800000> : vector<8xf32>
    %241 = vector.multi_reduction <maximumf>, %240, %cst_58 [1] : vector<8x12xf32> to vector<8xf32>
    %242 = vector.shape_cast %241 : vector<8xf32> to vector<8x1xf32>
    %243 = vector.broadcast %242 : vector<8x1xf32> to vector<8x12xf32>
    %244 = arith.subf %240, %243 : vector<8x12xf32>
    %245 = math.exp %244 : vector<8x12xf32>
    %cst_59 = arith.constant dense<0.000000e+00> : vector<8xf32>
    %246 = vector.multi_reduction <add>, %245, %cst_59 [1] : vector<8x12xf32> to vector<8xf32>
    %247 = vector.shape_cast %246 : vector<8xf32> to vector<8x1xf32>
    %248 = tpu.reciprocal %247 : vector<8x1xf32> -> vector<8x1xf32>
    %249 = vector.broadcast %248 : vector<8x1xf32> to vector<8x12xf32>
    %250 = arith.mulf %245, %249 : vector<8x12xf32>
    %251 = vector.extract_strided_slice %191 {offsets = [0, 3], sizes = [8, 1], strides = [1, 1]} : vector<8x8xf32> to vector<8x1xf32>
    %252 = vector.extract_strided_slice %193 {offsets = [3, 0], sizes = [1, 12], strides = [1, 1]} : vector<8x12xf32> to vector<1x12xf32>
    %253 = vector.broadcast %251 : vector<8x1xf32> to vector<8x12xf32>
    %254 = vector.broadcast %252 : vector<1x12xf32> to vector<8x12xf32>
    %255 = arith.addf %253, %254 : vector<8x12xf32>
    %cst_60 = arith.constant 2.000000e-01 : f32
    %256 = vector.broadcast %cst_60 : f32 to vector<8x12xf32>
    %257 = arith.mulf %256, %255 : vector<8x12xf32>
    %258 = arith.maximumf %255, %257 : vector<8x12xf32>
    %259 = arith.addf %258, %188 : vector<8x12xf32>
    %cst_61 = arith.constant dense<0xFF800000> : vector<8xf32>
    %260 = vector.multi_reduction <maximumf>, %259, %cst_61 [1] : vector<8x12xf32> to vector<8xf32>
    %261 = vector.shape_cast %260 : vector<8xf32> to vector<8x1xf32>
    %262 = vector.broadcast %261 : vector<8x1xf32> to vector<8x12xf32>
    %263 = arith.subf %259, %262 : vector<8x12xf32>
    %264 = math.exp %263 : vector<8x12xf32>
    %cst_62 = arith.constant dense<0.000000e+00> : vector<8xf32>
    %265 = vector.multi_reduction <add>, %264, %cst_62 [1] : vector<8x12xf32> to vector<8xf32>
    %266 = vector.shape_cast %265 : vector<8xf32> to vector<8x1xf32>
    %267 = tpu.reciprocal %266 : vector<8x1xf32> -> vector<8x1xf32>
    %268 = vector.broadcast %267 : vector<8x1xf32> to vector<8x12xf32>
    %269 = arith.mulf %264, %268 : vector<8x12xf32>
    %270 = vector.extract_strided_slice %191 {offsets = [0, 4], sizes = [8, 1], strides = [1, 1]} : vector<8x8xf32> to vector<8x1xf32>
    %271 = vector.extract_strided_slice %193 {offsets = [4, 0], sizes = [1, 12], strides = [1, 1]} : vector<8x12xf32> to vector<1x12xf32>
    %272 = vector.broadcast %270 : vector<8x1xf32> to vector<8x12xf32>
    %273 = vector.broadcast %271 : vector<1x12xf32> to vector<8x12xf32>
    %274 = arith.addf %272, %273 : vector<8x12xf32>
    %cst_63 = arith.constant 2.000000e-01 : f32
    %275 = vector.broadcast %cst_63 : f32 to vector<8x12xf32>
    %276 = arith.mulf %275, %274 : vector<8x12xf32>
    %277 = arith.maximumf %274, %276 : vector<8x12xf32>
    %278 = arith.addf %277, %188 : vector<8x12xf32>
    %cst_64 = arith.constant dense<0xFF800000> : vector<8xf32>
    %279 = vector.multi_reduction <maximumf>, %278, %cst_64 [1] : vector<8x12xf32> to vector<8xf32>
    %280 = vector.shape_cast %279 : vector<8xf32> to vector<8x1xf32>
    %281 = vector.broadcast %280 : vector<8x1xf32> to vector<8x12xf32>
    %282 = arith.subf %278, %281 : vector<8x12xf32>
    %283 = math.exp %282 : vector<8x12xf32>
    %cst_65 = arith.constant dense<0.000000e+00> : vector<8xf32>
    %284 = vector.multi_reduction <add>, %283, %cst_65 [1] : vector<8x12xf32> to vector<8xf32>
    %285 = vector.shape_cast %284 : vector<8xf32> to vector<8x1xf32>
    %286 = tpu.reciprocal %285 : vector<8x1xf32> -> vector<8x1xf32>
    %287 = vector.broadcast %286 : vector<8x1xf32> to vector<8x12xf32>
    %288 = arith.mulf %283, %287 : vector<8x12xf32>
    %289 = vector.extract_strided_slice %191 {offsets = [0, 5], sizes = [8, 1], strides = [1, 1]} : vector<8x8xf32> to vector<8x1xf32>
    %290 = vector.extract_strided_slice %193 {offsets = [5, 0], sizes = [1, 12], strides = [1, 1]} : vector<8x12xf32> to vector<1x12xf32>
    %291 = vector.broadcast %289 : vector<8x1xf32> to vector<8x12xf32>
    %292 = vector.broadcast %290 : vector<1x12xf32> to vector<8x12xf32>
    %293 = arith.addf %291, %292 : vector<8x12xf32>
    %cst_66 = arith.constant 2.000000e-01 : f32
    %294 = vector.broadcast %cst_66 : f32 to vector<8x12xf32>
    %295 = arith.mulf %294, %293 : vector<8x12xf32>
    %296 = arith.maximumf %293, %295 : vector<8x12xf32>
    %297 = arith.addf %296, %188 : vector<8x12xf32>
    %cst_67 = arith.constant dense<0xFF800000> : vector<8xf32>
    %298 = vector.multi_reduction <maximumf>, %297, %cst_67 [1] : vector<8x12xf32> to vector<8xf32>
    %299 = vector.shape_cast %298 : vector<8xf32> to vector<8x1xf32>
    %300 = vector.broadcast %299 : vector<8x1xf32> to vector<8x12xf32>
    %301 = arith.subf %297, %300 : vector<8x12xf32>
    %302 = math.exp %301 : vector<8x12xf32>
    %cst_68 = arith.constant dense<0.000000e+00> : vector<8xf32>
    %303 = vector.multi_reduction <add>, %302, %cst_68 [1] : vector<8x12xf32> to vector<8xf32>
    %304 = vector.shape_cast %303 : vector<8xf32> to vector<8x1xf32>
    %305 = tpu.reciprocal %304 : vector<8x1xf32> -> vector<8x1xf32>
    %306 = vector.broadcast %305 : vector<8x1xf32> to vector<8x12xf32>
    %307 = arith.mulf %302, %306 : vector<8x12xf32>
    %308 = vector.extract_strided_slice %191 {offsets = [0, 6], sizes = [8, 1], strides = [1, 1]} : vector<8x8xf32> to vector<8x1xf32>
    %309 = vector.extract_strided_slice %193 {offsets = [6, 0], sizes = [1, 12], strides = [1, 1]} : vector<8x12xf32> to vector<1x12xf32>
    %310 = vector.broadcast %308 : vector<8x1xf32> to vector<8x12xf32>
    %311 = vector.broadcast %309 : vector<1x12xf32> to vector<8x12xf32>
    %312 = arith.addf %310, %311 : vector<8x12xf32>
    %cst_69 = arith.constant 2.000000e-01 : f32
    %313 = vector.broadcast %cst_69 : f32 to vector<8x12xf32>
    %314 = arith.mulf %313, %312 : vector<8x12xf32>
    %315 = arith.maximumf %312, %314 : vector<8x12xf32>
    %316 = arith.addf %315, %188 : vector<8x12xf32>
    %cst_70 = arith.constant dense<0xFF800000> : vector<8xf32>
    %317 = vector.multi_reduction <maximumf>, %316, %cst_70 [1] : vector<8x12xf32> to vector<8xf32>
    %318 = vector.shape_cast %317 : vector<8xf32> to vector<8x1xf32>
    %319 = vector.broadcast %318 : vector<8x1xf32> to vector<8x12xf32>
    %320 = arith.subf %316, %319 : vector<8x12xf32>
    %321 = math.exp %320 : vector<8x12xf32>
    %cst_71 = arith.constant dense<0.000000e+00> : vector<8xf32>
    %322 = vector.multi_reduction <add>, %321, %cst_71 [1] : vector<8x12xf32> to vector<8xf32>
    %323 = vector.shape_cast %322 : vector<8xf32> to vector<8x1xf32>
    %324 = tpu.reciprocal %323 : vector<8x1xf32> -> vector<8x1xf32>
    %325 = vector.broadcast %324 : vector<8x1xf32> to vector<8x12xf32>
    %326 = arith.mulf %321, %325 : vector<8x12xf32>
    %327 = vector.extract_strided_slice %191 {offsets = [0, 7], sizes = [8, 1], strides = [1, 1]} : vector<8x8xf32> to vector<8x1xf32>
    %328 = vector.extract_strided_slice %193 {offsets = [7, 0], sizes = [1, 12], strides = [1, 1]} : vector<8x12xf32> to vector<1x12xf32>
    %329 = vector.broadcast %327 : vector<8x1xf32> to vector<8x12xf32>
    %330 = vector.broadcast %328 : vector<1x12xf32> to vector<8x12xf32>
    %331 = arith.addf %329, %330 : vector<8x12xf32>
    %cst_72 = arith.constant 2.000000e-01 : f32
    %332 = vector.broadcast %cst_72 : f32 to vector<8x12xf32>
    %333 = arith.mulf %332, %331 : vector<8x12xf32>
    %334 = arith.maximumf %331, %333 : vector<8x12xf32>
    %335 = arith.addf %334, %188 : vector<8x12xf32>
    %cst_73 = arith.constant dense<0xFF800000> : vector<8xf32>
    %336 = vector.multi_reduction <maximumf>, %335, %cst_73 [1] : vector<8x12xf32> to vector<8xf32>
    %337 = vector.shape_cast %336 : vector<8xf32> to vector<8x1xf32>
    %338 = vector.broadcast %337 : vector<8x1xf32> to vector<8x12xf32>
    %339 = arith.subf %335, %338 : vector<8x12xf32>
    %340 = math.exp %339 : vector<8x12xf32>
    %cst_74 = arith.constant dense<0.000000e+00> : vector<8xf32>
    %341 = vector.multi_reduction <add>, %340, %cst_74 [1] : vector<8x12xf32> to vector<8xf32>
    %342 = vector.shape_cast %341 : vector<8xf32> to vector<8x1xf32>
    %343 = tpu.reciprocal %342 : vector<8x1xf32> -> vector<8x1xf32>
    %344 = vector.broadcast %343 : vector<8x1xf32> to vector<8x12xf32>
    %345 = arith.mulf %340, %344 : vector<8x12xf32>
    %346 = tpu.concatenate %212, %231, %250, %269, %288, %307, %326, %345 in 1 : vector<8x12xf32>, vector<8x12xf32>, vector<8x12xf32>, vector<8x12xf32>, vector<8x12xf32>, vector<8x12xf32>, vector<8x12xf32>, vector<8x12xf32> -> vector<8x96xf32>
    %347 = vector.extract_strided_slice %189 {offsets = [0, 0], sizes = [12, 32], strides = [1, 1]} : vector<12x256xf32> to vector<12x32xf32>
    %348 = vector.extract_strided_slice %189 {offsets = [0, 32], sizes = [12, 32], strides = [1, 1]} : vector<12x256xf32> to vector<12x32xf32>
    %349 = vector.extract_strided_slice %189 {offsets = [0, 64], sizes = [12, 32], strides = [1, 1]} : vector<12x256xf32> to vector<12x32xf32>
    %350 = vector.extract_strided_slice %189 {offsets = [0, 96], sizes = [12, 32], strides = [1, 1]} : vector<12x256xf32> to vector<12x32xf32>
    %351 = vector.extract_strided_slice %189 {offsets = [0, 128], sizes = [12, 32], strides = [1, 1]} : vector<12x256xf32> to vector<12x32xf32>
    %352 = vector.extract_strided_slice %189 {offsets = [0, 160], sizes = [12, 32], strides = [1, 1]} : vector<12x256xf32> to vector<12x32xf32>
    %353 = vector.extract_strided_slice %189 {offsets = [0, 192], sizes = [12, 32], strides = [1, 1]} : vector<12x256xf32> to vector<12x32xf32>
    %354 = vector.extract_strided_slice %189 {offsets = [0, 224], sizes = [12, 32], strides = [1, 1]} : vector<12x256xf32> to vector<12x32xf32>
    %355 = tpu.concatenate %347, %348, %349, %350, %351, %352, %353, %354 in 0 : vector<12x32xf32>, vector<12x32xf32>, vector<12x32xf32>, vector<12x32xf32>, vector<12x32xf32>, vector<12x32xf32>, vector<12x32xf32>, vector<12x32xf32> -> vector<96x32xf32>
    %cst_75 = arith.constant dense<0.000000e+00> : vector<8x32xf32>
    %356 = tpu.matmul %346, %355, %cst_75 {dimension_numbers = #tpu.dot_dimension_numbers<[1], [0], [0], [1], [0, 0, 1, 1], [], []>} : vector<8x96xf32>, vector<96x32xf32>, vector<8x32xf32> -> vector<8x32xf32>
    %cst_76 = arith.constant 1.250000e-01 : f32
    %357 = vector.broadcast %cst_76 : f32 to vector<8x32xf32>
    %358 = arith.mulf %356, %357 : vector<8x32xf32>
    %359 = vector.broadcast %187 : vector<1x32xf32> to vector<8x32xf32>
    %360 = arith.addf %358, %359 : vector<8x32xf32>
    %cst_77 = arith.constant 0.000000e+00 : f32
    %361 = vector.broadcast %cst_77 : f32 to vector<8x32xf32>
    %362 = arith.cmpf ogt, %360, %361 : vector<8x32xf32>
    %363 = math.exp %360 : vector<8x32xf32>
    %cst_78 = arith.constant 1.000000e+00 : f32
    %364 = vector.broadcast %cst_78 : f32 to vector<8x32xf32>
    %365 = arith.subf %363, %364 : vector<8x32xf32>
    %366 = arith.select %362, %360, %365 : vector<8x32xi1>, vector<8x32xf32>
    %c0_79 = arith.constant 0 : index
    %c0_80 = arith.constant 0 : index
    %367 = vector.load %arg16[%c0_79, %c0_80] : memref<8x32xf32, #tpu.memory_space<vmem>>, vector<8x32xf32>
    tpu.vector_store %arg16[%c0_79, %c0_80], %366 {strides = array<i32>} : memref<8x32xf32, #tpu.memory_space<vmem>>, vector<8x32xf32>,
    %c0_81 = arith.constant 0 : index
    %368 = memref.load %arg0[%c0_81] : memref<3xi32, #tpu.memory_space<smem>>
    %369 = arith.index_cast %368 : i32 to index
    %c0_82 = arith.constant 0 : index
    %370 = vector.load %arg16[%369, %c0_82] : memref<8x32xf32, #tpu.memory_space<vmem>>, vector<1x32xf32>
    %c0_83 = arith.constant 0 : index
    %c0_84 = arith.constant 0 : index
    %371 = vector.load %arg17[%c0_83, %c0_84] : memref<3x32xf32, #tpu.memory_space<vmem>>, vector<1x32xf32>
    tpu.vector_store %arg17[%c0_83, %c0_84], %370 {strides = array<i32>} : memref<3x32xf32, #tpu.memory_space<vmem>>, vector<1x32xf32>,
    %c0_85 = arith.constant 0 : index
    %372 = memref.load %arg1[%c0_85] : memref<3xi32, #tpu.memory_space<smem>>
    %373 = arith.index_cast %372 : i32 to index
    %c0_86 = arith.constant 0 : index
    %374 = vector.load %arg16[%373, %c0_86] : memref<8x32xf32, #tpu.memory_space<vmem>>, vector<1x32xf32>
    %c0_87 = arith.constant 0 : index
    %c0_88 = arith.constant 0 : index
    %375 = vector.load %arg18[%c0_87, %c0_88] : memref<3x32xf32, #tpu.memory_space<vmem>>, vector<1x32xf32>
    tpu.vector_store %arg18[%c0_87, %c0_88], %374 {strides = array<i32>} : memref<3x32xf32, #tpu.memory_space<vmem>>, vector<1x32xf32>,
    %c1 = arith.constant 1 : index
    %376 = memref.load %arg0[%c1] : memref<3xi32, #tpu.memory_space<smem>>
    %377 = arith.index_cast %376 : i32 to index
    %c0_89 = arith.constant 0 : index
    %378 = vector.load %arg16[%377, %c0_89] : memref<8x32xf32, #tpu.memory_space<vmem>>, vector<1x32xf32>
    %c1_90 = arith.constant 1 : index
    %c0_91 = arith.constant 0 : index
    %379 = vector.load %arg17[%c1_90, %c0_91] : memref<3x32xf32, #tpu.memory_space<vmem>>, vector<1x32xf32>
    tpu.vector_store %arg17[%c1_90, %c0_91], %378 {strides = array<i32>} : memref<3x32xf32, #tpu.memory_space<vmem>>, vector<1x32xf32>,
    %c1_92 = arith.constant 1 : index
    %380 = memref.load %arg1[%c1_92] : memref<3xi32, #tpu.memory_space<smem>>
    %381 = arith.index_cast %380 : i32 to index
    %c0_93 = arith.constant 0 : index
    %382 = vector.load %arg16[%381, %c0_93] : memref<8x32xf32, #tpu.memory_space<vmem>>, vector<1x32xf32>
    %c1_94 = arith.constant 1 : index
    %c0_95 = arith.constant 0 : index
    %383 = vector.load %arg18[%c1_94, %c0_95] : memref<3x32xf32, #tpu.memory_space<vmem>>, vector<1x32xf32>
    tpu.vector_store %arg18[%c1_94, %c0_95], %382 {strides = array<i32>} : memref<3x32xf32, #tpu.memory_space<vmem>>, vector<1x32xf32>,
    %c2 = arith.constant 2 : index
    %384 = memref.load %arg0[%c2] : memref<3xi32, #tpu.memory_space<smem>>
    %385 = arith.index_cast %384 : i32 to index
    %c0_96 = arith.constant 0 : index
    %386 = vector.load %arg16[%385, %c0_96] : memref<8x32xf32, #tpu.memory_space<vmem>>, vector<1x32xf32>
    %c2_97 = arith.constant 2 : index
    %c0_98 = arith.constant 0 : index
    %387 = vector.load %arg17[%c2_97, %c0_98] : memref<3x32xf32, #tpu.memory_space<vmem>>, vector<1x32xf32>
    tpu.vector_store %arg17[%c2_97, %c0_98], %386 {strides = array<i32>} : memref<3x32xf32, #tpu.memory_space<vmem>>, vector<1x32xf32>,
    %c2_99 = arith.constant 2 : index
    %388 = memref.load %arg1[%c2_99] : memref<3xi32, #tpu.memory_space<smem>>
    %389 = arith.index_cast %388 : i32 to index
    %c0_100 = arith.constant 0 : index
    %390 = vector.load %arg16[%389, %c0_100] : memref<8x32xf32, #tpu.memory_space<vmem>>, vector<1x32xf32>
    %c2_101 = arith.constant 2 : index
    %c0_102 = arith.constant 0 : index
    %391 = vector.load %arg18[%c2_101, %c0_102] : memref<3x32xf32, #tpu.memory_space<vmem>>, vector<1x32xf32>
    tpu.vector_store %arg18[%c2_101, %c0_102], %390 {strides = array<i32>} : memref<3x32xf32, #tpu.memory_space<vmem>>, vector<1x32xf32>,
    %c0_103 = arith.constant 0 : index
    %c0_104 = arith.constant 0 : index
    %392 = vector.load %arg17[%c0_103, %c0_104] : memref<3x32xf32, #tpu.memory_space<vmem>>, vector<3x32xf32>
    %c0_105 = arith.constant 0 : index
    %c0_106 = arith.constant 0 : index
    %393 = vector.load %arg12[%c0_105, %c0_106] : memref<32x32xf32, #tpu.memory_space<vmem>>, vector<32x32xf32>
    %cst_107 = arith.constant dense<0.000000e+00> : vector<3x32xf32>
    %394 = tpu.matmul %392, %393, %cst_107 {dimension_numbers = #tpu.dot_dimension_numbers<[1], [0], [0], [1], [0, 0, 1, 1], [], []>} : vector<3x32xf32>, vector<32x32xf32>, vector<3x32xf32> -> vector<3x32xf32>
    %c0_108 = arith.constant 0 : index
    %c0_109 = arith.constant 0 : index
    %395 = vector.load %arg18[%c0_108, %c0_109] : memref<3x32xf32, #tpu.memory_space<vmem>>, vector<3x32xf32>
    %c0_110 = arith.constant 0 : index
    %c0_111 = arith.constant 0 : index
    %396 = vector.load %arg13[%c0_110, %c0_111] : memref<32x32xf32, #tpu.memory_space<vmem>>, vector<32x32xf32>
    %cst_112 = arith.constant dense<0.000000e+00> : vector<3x32xf32>
    %397 = tpu.matmul %395, %396, %cst_112 {dimension_numbers = #tpu.dot_dimension_numbers<[1], [0], [0], [1], [0, 0, 1, 1], [], []>} : vector<3x32xf32>, vector<32x32xf32>, vector<3x32xf32> -> vector<3x32xf32>
    %398 = arith.addf %394, %397 : vector<3x32xf32>
    %cst_113 = arith.constant 0.000000e+00 : f32
    %399 = vector.broadcast %cst_113 : f32 to vector<3x32xf32>
    %400 = arith.cmpf ogt, %398, %399 : vector<3x32xf32>
    %401 = math.exp %398 : vector<3x32xf32>
    %cst_114 = arith.constant 1.000000e+00 : f32
    %402 = vector.broadcast %cst_114 : f32 to vector<3x32xf32>
    %403 = arith.subf %401, %402 : vector<3x32xf32>
    %404 = arith.select %400, %398, %403 : vector<3x32xi1>, vector<3x32xf32>
    %c0_115 = arith.constant 0 : index
    %c0_116 = arith.constant 0 : index
    %405 = vector.load %arg14[%c0_115, %c0_116] : memref<32x1xf32, #tpu.memory_space<vmem>>, vector<32x1xf32>
    %cst_117 = arith.constant dense<0.000000e+00> : vector<3x1xf32>
    %406 = tpu.matmul %404, %405, %cst_117 {dimension_numbers = #tpu.dot_dimension_numbers<[1], [0], [0], [1], [0, 0, 1, 1], [], []>} : vector<3x32xf32>, vector<32x1xf32>, vector<3x1xf32> -> vector<3x1xf32>
    %c0_118 = arith.constant 0 : index
    %c0_119 = arith.constant 0 : index
    %407 = vector.load %arg15[%c0_118, %c0_119] : memref<3x1xf32, #tpu.memory_space<vmem>>, vector<3x1xf32>
    tpu.vector_store %arg15[%c0_118, %c0_119], %406 {strides = array<i32>} : memref<3x1xf32, #tpu.memory_space<vmem>>, vector<3x1xf32>,
    return
  }
}

</mosaic_0001>

<bundles_post_ra>
// kernel: gat_forward.1
= control target key start
LH: loop header
LB: loop body
LE: loop exit
PB: predicated region body
PF: predicated region fallthrough
CT: control target
= control target key end

     0   :  { %20 = vsyncpa [#allocation6], 0  ;;  %s3102_s0 = inlined_call_operand.vmem [shape: s32[3], index: 0, kind: input, shape index: {}]   ;;  %s3103_s1 = inlined_call_operand.vmem [shape: s32[3], index: 1, kind: input, shape index: {}]   ;;  %s3104_s2 = inlined_call_operand.vmem [shape: f32[16,16], index: 2, kind: input, shape index: {}]   ;;  %s3105_s3 = inlined_call_operand.vmem [shape: f32[16,32], index: 3, kind: input, shape index: {}]   ;;  %s3106_s4 = inlined_call_operand.vmem [shape: f32[32,256], index: 4, kind: input, shape index: {}]   ;;  %s3107_s5 = inlined_call_operand.vmem [shape: f32[256,16], index: 5, kind: input, shape index: {}]   ;;  %s3108_s6 = inlined_call_operand.vmem [shape: f32[1,32], index: 6, kind: input, shape index: {}]   ;;  %s3109_s7 = inlined_call_operand.vmem [shape: f32[12,16], index: 7, kind: input, shape index: {}]   ;;  %s3110_s8 = inlined_call_operand.vmem [shape: f32[32,256], index: 8, kind: input, shape index: {}]   ;;  %s3111_s9 = inlined_call_operand.vmem [shape: f32[256,16], index: 9, kind: input, shape index: {}]   ;;  %s3112_s10 = inlined_call_operand.vmem [shape: f32[1,32], index: 10, kind: input, shape index: {}]   ;;  %s3113_s11 = inlined_call_operand.vmem [shape: f32[8,12], index: 11, kind: input, shape index: {}]   ;;  %s3114_s12 = inlined_call_operand.vmem [shape: f32[32,32], index: 12, kind: input, shape index: {}]   ;;  %s3115_s13 = inlined_call_operand.vmem [shape: f32[32,32], index: 13, kind: input, shape index: {}]   ;;  %s3116_s14 = inlined_call_operand.vmem [shape: f32[32,1], index: 14, kind: input, shape index: {}]   ;;  %s3117_s15 = inlined_call_operand.vmem [shape: f32[3,1], index: 15, kind: output, shape index: {}]  }
   0x1   :  { %s27_s20 = sshll.u32 %s3102_s0, 4  ;;  %s28_s20 = int_to_ptr.vmem [resolvable:$true] %s27_s20 }
   0x2   :  { %21 = vsyncpa [#allocation8], 0  ;;  %s36_s23 = sshll.u32 %s3103_s1, 4  ;;  %s1950_s24 = smov [#allocation5]   ;;  %s37_s23 = int_to_ptr.vmem [resolvable:$true] %s36_s23 }
   0x3   :  { %30 = dma.vmem_to_smem %s28_s20, 16, %s1950_s24, [#allocation6]  }
   0x4   :  { %s1951_s25 = smov [#allocation7]  }
   0x5   :  { %39 = dma.vmem_to_smem %s37_s23, 16, %s1951_s25, [#allocation8]  }
   0x6   :  { %1946 = dma.done.wait [#allocation6], 16  }
   0x7   :  { %1947 = vsyncadd [#allocation6], 4294967280 }
   0x8   :  { %1948 = dma.done.wait [#allocation8], 16  }
   0x9   :  { %1949 = vsyncadd [#allocation8], 4294967280 }
   0xa   :  { %74 = sfence }
   0xb   :  { %v78_v0 = vld [vmem:[%s3105_s3 + $0x8] sm:$0xff]  ;;  %v77_v1 = vld [vmem:[%s3105_s3] sm:$0xff]  ;;  %vm79_vm0 = vcmask 130048   ;;  %v115_v3 = vld [vmem:[%s3106_s4 + $0x30] sm:$0xff]  ;;  %vm152_vm1 = vcmask 261120   ;;  %v1952_v50 = vmov 3  }
   0xc   :  { %100 = vmatpush.msra.mxu0 %v78_v0  ;;  %v75_v2 = vld [vmem:[%s3104_s2] sm:$0xff]  ;;  %v116_v4 = vld [vmem:[%s3106_s4 + $0x38] sm:$0xff]  ;;  %171 = vmatpush.msra.mxu1 %v115_v3  ;;  %v114_v6 = vld [vmem:[%s3106_s4 + $0x28] sm:$0xff]  ;;  %v1953_v51 = vmov 1   ;;  %v1954_v52 = vmov 5   ;;  %v1956_v56 = vmov 4  }
   0xd   :  { %194 = vmatpush.msra.mxu2 %v116_v4  ;;  %v113_v5 = vld [vmem:[%s3106_s4 + $0x20] sm:$0xff]  ;;  %v111_v7 = vld [vmem:[%s3106_s4 + $0x10] sm:$0xff]  ;;  %v112_v8 = vld [vmem:[%s3106_s4 + $0x18] sm:$0xff]  ;;  %1713 = vset.pattern.permute.xlu2 %v1952_v50  ;;  %v1957_v57 = vmov 2   ;;  %v1958_v61 = vmov 7   ;;  %v1959_v62 = vmov 6  }
   0xe   :  { %101 = vmatpush.msra.mxu0 %v77_v1  ;;  %172 = vmatpush.msra.mxu1 %v113_v5  ;;  %v76_v9 = vld [vmem:[%s3104_s2 + $0x8] sm:$0xff]  ;;  %v109_v10 = vld [vmem:[%s3106_s4] sm:$0xff]  ;;  %v132_v12 = vld [vmem:[%s3107_s5 + $0x78] sm:$0xff]  ;;  %v1960_v63 = vmov 0   ;;  %vm311_vm2 = vcmask 125952   ;;  %s1963_s21 = smov 64  }
   0xf   :  { %1664 = vmatmul.msk.f32.vlgmr.msra.gmra.mxu0 %vm79_vm0, %v75_v2  ;;  %195 = vmatpush.msra.mxu2 %v114_v6  ;;  %v110_v11 = vld [vmem:[%s3106_s4 + $0x8] sm:$0xff]  ;;  %v131_v13 = vld [vmem:[%s3107_s5 + $0x70] sm:$0xff]  ;;  %v148_v14 = vld [vmem:[%s3107_s5 + $0xf8] sm:$0xff]  ;;  %s1961_s4 = smov 96   ;;  %s1964_s22 = smov 16  }
  0x10   :  { %173 = vmatpush.msra.mxu1 %v111_v7  ;;  %205 = vmatpush.msra.mxu3 %v132_v12  ;;  %v130_v15 = vld [vmem:[%s3107_s5 + $0x68] sm:$0xff]  ;;  %v147_v16 = vld [vmem:[%s3107_s5 + $0xf0] sm:$0xff]  ;;  %v129_v18 = vld [vmem:[%s3107_s5 + $0x60] sm:$0xff]  ;;  %s1965_s23 = smov 48   ;;  %s1966_s24 = smov 80  }
  0x11   :  { %196 = vmatpush.msra.mxu2 %v112_v8  ;;  %228 = vmatpush.msrb.mxu0 %v148_v14  ;;  %v146_v17 = vld [vmem:[%s3107_s5 + $0xe8] sm:$0xff]  ;;  %v145_v19 = vld [vmem:[%s3107_s5 + $0xe0] sm:$0xff]  ;;  %v128_v20 = vld [vmem:[%s3107_s5 + $0x58] sm:$0xff]  ;;  %s1967_s25 = smov 112   ;;  %s1972_s30 = smov 60  }
  0x12   :  { %174 = vmatpush.msra.mxu1 %v109_v10  ;;  %206 = vmatpush.msra.mxu3 %v131_v13  ;;  %v144_v21 = vld [vmem:[%s3107_s5 + $0xd8] sm:$0xff]  ;;  %v127_v22 = vld [vmem:[%s3107_s5 + $0x50] sm:$0xff]  ;;  %v126_v24 = vld [vmem:[%s3107_s5 + $0x48] sm:$0xff]  ;;  %s1973_s16 = smov 84   ;;  %s1542_s29 = sld [smem:[#allocation7]] }
  0x13   :  { %197 = vmatpush.msra.mxu2 %v110_v11  ;;  %229 = vmatpush.msrb.mxu0 %v147_v16  ;;  %v143_v23 = vld [vmem:[%s3107_s5 + $0xd0] sm:$0xff]  ;;  %v142_v25 = vld [vmem:[%s3107_s5 + $0xc8] sm:$0xff]  ;;  %v125_v26 = vld [vmem:[%s3107_s5 + $0x40] sm:$0xff] }
  0x14   :  { %207 = vmatpush.msra.mxu3 %v130_v15  ;;  %v141_v27 = vld [vmem:[%s3107_s5 + $0xc0] sm:$0xff]  ;;  %v124_v28 = vld [vmem:[%s3107_s5 + $0x38] sm:$0xff]  ;;  %v123_v30 = vld [vmem:[%s3107_s5 + $0x30] sm:$0xff]  ;;  %1711 = vset.pattern.permute.xlu1 %v1953_v51 }
  0x15   :  { %230 = vmatpush.msrb.mxu0 %v146_v17  ;;  %v140_v29 = vld [vmem:[%s3107_s5 + $0xb8] sm:$0xff]  ;;  %v139_v31 = vld [vmem:[%s3107_s5 + $0xb0] sm:$0xff]  ;;  %v122_v32 = vld [vmem:[%s3107_s5 + $0x28] sm:$0xff]  ;;  %1715 = vset.pattern.permute.xlu0 %v1954_v52 }
  0x16   :  { %208 = vmatpush.msra.mxu3 %v129_v18  ;;  %v138_v33 = vld [vmem:[%s3107_s5 + $0xa8] sm:$0xff]  ;;  %v121_v34 = vld [vmem:[%s3107_s5 + $0x20] sm:$0xff]  ;;  %v120_v35 = vld [vmem:[%s3107_s5 + $0x18] sm:$0xff] }
  0x17   :  { %1665 = vmatmul.msk.f32.gmra.mxu0 %vm79_vm0, %v76_v9  ;;  %v137_v36 = vld [vmem:[%s3107_s5 + $0xa0] sm:$0xff]  ;;  %v119_v38 = vld [vmem:[%s3107_s5 + $0x10] sm:$0xff]  ;;  %v118_v39 = vld [vmem:[%s3107_s5 + $0x8] sm:$0xff] }
  0x18   :  { %231 = vmatpush.msrb.mxu0 %v145_v19  ;;  %209 = vmatpush.msra.mxu3 %v128_v20  ;;  %v117_v41 = vld [vmem:[%s3107_s5] sm:$0xff]  ;;  %v136_v42 = vld [vmem:[%s3107_s5 + $0x98] sm:$0xff]  ;;  %v135_v43 = vld [vmem:[%s3107_s5 + $0x90] sm:$0xff] }
  0x19   :  { %v134_v44 = vld [vmem:[%s3107_s5 + $0x88] sm:$0xff]  ;;  %v133_v45 = vld [vmem:[%s3107_s5 + $0x80] sm:$0xff]  ;;  %s1955_s5 = smov 120  }
  0x1a   :  { %232 = vmatpush.msrb.mxu0 %v144_v21  ;;  %210 = vmatpush.msra.mxu3 %v127_v22 }
  0x1c   :  { %233 = vmatpush.msrb.mxu0 %v143_v23  ;;  %211 = vmatpush.msra.mxu3 %v126_v24  ;;  %v2236_v24 = vld [vmem:[%s3109_s7] sm:$0xff] }
  0x1e   :  { %234 = vmatpush.msrb.mxu0 %v142_v25  ;;  %212 = vmatpush.msra.mxu3 %v125_v26 }
  0x20   :  { %235 = vmatpush.msrb.mxu0 %v141_v27  ;;  %213 = vmatpush.msra.mxu3 %v124_v28 }
  0x22   :  { %236 = vmatpush.msrb.mxu0 %v140_v29  ;;  %214 = vmatpush.msra.mxu3 %v123_v30 }
  0x24   :  { %237 = vmatpush.msrb.mxu0 %v139_v31  ;;  %215 = vmatpush.msra.mxu3 %v122_v32 }
  0x26   :  { %238 = vmatpush.msrb.mxu0 %v138_v33  ;;  %216 = vmatpush.msra.mxu3 %v121_v34 }
  0x28   :  { %217 = vmatpush.msra.mxu3 %v120_v35  ;;  %239 = vmatpush.msrb.mxu0 %v137_v36 }
  0x2a   :  { %218 = vmatpush.msra.mxu3 %v119_v38  ;;  %240 = vmatpush.msrb.mxu0 %v136_v42 }
  0x2c   :  { %219 = vmatpush.msra.mxu3 %v118_v39  ;;  %241 = vmatpush.msrb.mxu0 %v135_v43 }
  0x2e   :  { %220 = vmatpush.msra.mxu3 %v117_v41  ;;  %242 = vmatpush.msrb.mxu0 %v134_v44 }
  0x30   :  { %243 = vmatpush.msrb.mxu0 %v133_v45 }
  0x8c   :  { %v103_v37 = vpop.f32.mrf.mxu0 }
  0x8d   :  { %1666 = vmatmul.msk.f32.vlgmr.msra.gmra.mxu1 %vm152_vm1, %v103_v37  ;;  %1668 = vmatmul.msk.f32.vlgmr.msra.gmra.mxu2 %vm152_vm1, %v103_v37 }
  0x94   :  { %v106_v40 = vpop.f32.mrf.mxu0 }
  0x95   :  { %1667 = vmatmul.msk.f32.gmra.mxu1 %vm152_vm1, %v106_v40  ;;  %1669 = vmatmul.msk.f32.gmra.mxu2 %vm152_vm1, %v106_v40 }
 0x10a   :  { %v2198_v46 = vpop.f32.mrf.mxu1 }
 0x10b   :  { %221 = vmatmul.f32.vlgmr.msra.gmra.mxu3 %v2198_v46 }
 0x110   :  { %v2201_v47 = vpop.f32.mrf.mxu2 }
 0x111   :  { %244 = vmatmul.f32.vlgmr.msrb.gmra.mxu0 %v2201_v47 }
 0x112   :  { %v2204_v48 = vpop.f32.mrf.mxu1 }
 0x113   :  { %224 = vmatmul.f32.gmra.mxu3 %v2204_v48 }
 0x118   :  { %v2207_v49 = vpop.f32.mrf.mxu2 }
 0x119   :  { %247 = vmatmul.f32.gmra.mxu0 %v2207_v49 }
 0x18e   :  { %v222_v53 = vpop.f32.mrf.mxu3  ;;  %v245_v54 = vpop.f32.mrf.mxu0 }
 0x18f   :  { %v246_v55 = vadd.f32 %v245_v54, %v222_v53 }
 0x191   :  { %488 = vperm.xlu2 %1713, %v246_v55   ;;  %358 = vperm.xlu1 %1711, %v246_v55  }
 0x192   :  { %253 = vrot.lane.b32.xlu0 %v246_v55, %s1955_s5 }
 0x196   :  { %v225_v58 = vpop.f32.mrf.mxu3  ;;  %v248_v59 = vpop.f32.mrf.mxu0 }
 0x197   :  { %v249_v60 = vadd.f32 %v248_v59, %v225_v58 }
 0x199   :  { %1714 = vset.pattern.permute.xlu2 %v1956_v56  ;;  %1712 = vset.pattern.permute.xlu1 %v1957_v57 }
 0x19a   :  { %618 = vperm.xlu0 %1715, %v246_v55   ;;  %553 = vperm.xlu2 %1714, %v246_v55  }
 0x19b   :  { %423 = vperm.xlu1 %1712, %v246_v55  }
 0x1a2   :  { %255 = vrot.lane.b32.xlu0 %v249_v60, %s1955_s5  ;;  %1717 = vset.pattern.permute.xlu2 %v1958_v61 }
 0x1a3   :  { %1716 = vset.pattern.permute.xlu1 %v1959_v62  ;;  %748 = vperm.xlu2 %1717, %v246_v55  }
 0x1a4   :  { %683 = vperm.xlu1 %1716, %v246_v55   ;;  %1721 = vset.pattern.permute.xlu0 %v1952_v50 }
 0x1aa   :  { %492 = vperm.xlu0 %1721, %v249_v60  }
 0x1ab   :  { %1720 = vset.pattern.permute.xlu2 %v1957_v57 }
 0x1ac   :  { %1718 = vset.pattern.permute.xlu1 %v1960_v63  ;;  %427 = vperm.xlu2 %1720, %v249_v60  }
 0x1ad   :  { %292 = vperm.xlu1 %1718, %v246_v55  }
 0x1b4   :  { %1723 = vset.pattern.permute.xlu2 %v1954_v52 }
 0x1b5   :  { %1719 = vset.pattern.permute.xlu1 %v1953_v51  ;;  %622 = vperm.xlu2 %1723, %v249_v60  }
 0x1b6   :  { %362 = vperm.xlu1 %1719, %v249_v60  }
 0x1bd   :  { %1725 = vset.pattern.permute.xlu2 %v1958_v61 }
 0x1be   :  { %1722 = vset.pattern.permute.xlu1 %v1956_v56  ;;  %752 = vperm.xlu2 %1725, %v249_v60  }
 0x1bf   :  { %557 = vperm.xlu1 %1722, %v249_v60  }
 0x1c6   :  { %1726 = vset.pattern.permute.xlu2 %v1960_v63 }
 0x1c7   :  { %1724 = vset.pattern.permute.xlu1 %v1959_v62  ;;  %296 = vperm.xlu2 %1726, %v249_v60  }
 0x1c8   :  { %687 = vperm.xlu1 %1724, %v249_v60  }
 0x1cf   :  { %1778 = vset.pattern.permute.xlu2 %v1957_v57 }
 0x1d0   :  { %1779 = vset.pattern.permute.xlu1 %v1952_v50 }
 0x1eb   :  { %v489_v5 = vpop.permute.xlu2 %488 }
 0x1f4   :  { %v554_v8 = vpop.permute.xlu2 %553 }
 0x1fd   :  { %v749_v32 = vpop.permute.xlu2 %748 }
 0x203   :  { %v359_v3 = vpop.permute.xlu1 %358 }
 0x204   :  { %v254_v0 = vpop.permute.xlu0 %253 }
 0x205   :  { %259 = vxpose.xlu0.b32.start [1/2] (short) (narrow) %v254_v0, 8 }
 0x206   :  { %v428_v53 = vpop.permute.xlu2 %427 }
 0x20c   :  { %v619_v1 = vpop.permute.xlu0 %618 }
 0x20d   :  { %v424_v4 = vpop.permute.xlu1 %423 }
 0x214   :  { %v256_v2 = vpop.permute.xlu0 %255 }
 0x215   :  { %260 = vxpose.xlu0.b32.end [2/2] (short) (narrow) %v256_v2, 8 }
 0x216   :  { %v684_v7 = vpop.permute.xlu1 %683 }
 0x21c   :  { %v493_v6 = vpop.permute.xlu0 %492 }
 0x21f   :  { %v2231_v20 = vpop.permute.xlu1 %292 }
 0x228   :  { %v363_v43 = vpop.permute.xlu1 %362 }
 0x27c   :  { %1777 = vset.pattern.permute.xlu0 %v1953_v51 }
 0x2b1   :  { %v2222_v9 = vpop.trf.xlu0 }
 0x2b2   :  { %v495_v10 = vperm.slane %v2222_v9, 3  ;;  %v430_v11 = vperm.slane %v2222_v9, 2  ;;  %v365_v12 = vperm.slane %v2222_v9, 1  ;;  %v560_v13 = vperm.slane %v2222_v9, 4 }
 0x2b3   :  { %v625_v14 = vperm.slane %v2222_v9, 5  ;;  %v690_v25 = vperm.slane %v2222_v9, 6  ;;  %v755_v31 = vperm.slane %v2222_v9, 7 }
 0x2b4   :  { %v496_v15 = vadd.f32 %v495_v10, %v489_v5  ;;  %v431_v16 = vadd.f32 %v430_v11, %v424_v4  ;;  %v366_v17 = vadd.f32 %v365_v12, %v359_v3  ;;  %v561_v18 = vadd.f32 %v560_v13, %v554_v8  ;;  %v558_v4 = vpop.permute.xlu1 %557 }
 0x2b5   :  { %v626_v19 = vadd.f32 %v625_v14, %v619_v1  ;;  %v691_v36 = vadd.f32 %v690_v25, %v684_v7  ;;  %v756_v42 = vadd.f32 %v755_v31, %v749_v32  ;;  %v367_v57 = vadd.f32 %v365_v12, %v363_v43 }
 0x2b6   :  { %v498_v21 = vmul.f32 0.2, %v496_v15  ;;  %v433_v22 = vmul.f32 0.2, %v431_v16  ;;  %v368_v23 = vmul.f32 0.2, %v366_v17  ;;  %v432_v60 = vadd.f32 %v430_v11, %v428_v53 }
 0x2b7   :  { %v563_v29 = vmul.f32 0.2, %v561_v18  ;;  %v628_v30 = vmul.f32 0.2, %v626_v19  ;;  %v693_v45 = vmul.f32 0.2, %v691_v36  ;;  %v497_v8 = vadd.f32 %v495_v10, %v493_v6 }
 0x2b8   :  { %v500_v26 = vmax.f32 %v496_v15, %v498_v21  ;;  %v435_v27 = vmax.f32 %v431_v16, %v433_v22  ;;  %v370_v28 = vmax.f32 %v366_v17, %v368_v23  ;;  %v758_v51 = vmul.f32 0.2, %v756_v42  ;;  %v151_v11 = vld [vmem:[%s3109_s7 + $0x8] sm:$0xf]  ;;  %v623_v17 = vpop.permute.xlu2 %622  ;;  %s1962_s7 = smov 32  }
 0x2b9   :  { %v565_v40 = vmax.f32 %v561_v18, %v563_v29  ;;  %v630_v41 = vmax.f32 %v626_v19, %v628_v30  ;;  %v695_v55 = vmax.f32 %v691_v36, %v693_v45  ;;  %v369_v1 = vmul.f32 0.2, %v367_v57 }
 0x2ba   :  { %v2241_v33 = vadd.f32 %v500_v26, %v2236_v24  ;;  %v2244_v34 = vadd.f32 %v435_v27, %v2236_v24  ;;  %v2247_v35 = vadd.f32 %v370_v28, %v2236_v24  ;;  %v760_v59 = vmax.f32 %v756_v42, %v758_v51 }
 0x2bb   :  { %v2260_v44 = vadd.f32 %v565_v40, %v2236_v24  ;;  %v2263_v50 = vadd.f32 %v630_v41, %v2236_v24  ;;  %v2270_v0 = vadd.f32 %v695_v55, %v2236_v24  ;;  %v434_v3 = vmul.f32 0.2, %v432_v60 }
 0x2bc   :  { %v504_v37 = vsel %vm79_vm0, %v2241_v33, -inf  ;;  %v439_v38 = vsel %vm79_vm0, %v2244_v34, -inf  ;;  %v374_v39 = vsel %vm79_vm0, %v2247_v35, -inf  ;;  %v2273_v2 = vadd.f32 %v760_v59, %v2236_v24  ;;  %v688_v22 = vpop.permute.xlu1 %687 }
 0x2bd   :  { %505 = vmax.xlane.f32.xlu0 %v504_v37  ;;  %440 = vmax.xlane.f32.xlu2 %v439_v38  ;;  %v569_v54 = vsel %vm79_vm0, %v2260_v44, -inf  ;;  %v634_v58 = vsel %vm79_vm0, %v2263_v50, -inf  ;;  %v699_v5 = vsel %vm79_vm0, %v2270_v0, -inf  ;;  %v371_v7 = vmax.f32 %v367_v57, %v369_v1 }
 0x2be   :  { %375 = vmax.xlane.f32.xlu1 %v374_v39  ;;  %v764_v12 = vsel %vm79_vm0, %v2273_v2, -inf  ;;  %v436_v15 = vmax.f32 %v432_v60, %v434_v3  ;;  %v562_v16 = vadd.f32 %v560_v13, %v558_v4  ;;  %v2284_v18 = vpack.i.bf16 %v2201_v47, %v2207_v49 }
 0x2bf   :  { %v2286_v19 = vadd.f32 %v371_v7, %v151_v11  ;;  %v499_v21 = vmul.f32 0.2, %v497_v8  ;;  %v627_v26 = vadd.f32 %v625_v14, %v623_v17  ;;  %v692_v29 = vadd.f32 %v690_v25, %v688_v22 }
 0x2c0   :  { %v2290_v6 = vadd.f32 %v436_v15, %v151_v11  ;;  %v564_v10 = vmul.f32 0.2, %v562_v16  ;;  %v2302_v30 = vpack.i.bf16 %v2198_v46, %v2204_v48  ;;  %v753_v37 = vpop.permute.xlu2 %752  ;;  %v299_v39 = vperm.slane %v2222_v9, 0 }
 0x2c1   :  { %v377_v13 = vsel %vm311_vm2, %v2286_v19, -inf  ;;  %v501_v23 = vmax.f32 %v497_v8, %v499_v21  ;;  %v629_v36 = vmul.f32 0.2, %v627_v26  ;;  %v694_v38 = vmul.f32 0.2, %v692_v29 }
 0x2c2   :  { %v442_v27 = vsel %vm311_vm2, %v2290_v6, -inf  ;;  %v566_v28 = vmax.f32 %v562_v16, %v564_v10  ;;  %v757_v41 = vadd.f32 %v755_v31, %v753_v37  ;;  %v300_v45 = vadd.f32 %v299_v39, %v2231_v20 }
 0x2c3   :  { %v2304_v32 = vadd.f32 %v501_v23, %v151_v11  ;;  %v631_v40 = vmax.f32 %v627_v26, %v629_v36  ;;  %v696_v43 = vmax.f32 %v692_v29, %v694_v38 }
 0x2c4   :  { %v2308_v14 = vadd.f32 %v566_v28, %v151_v11  ;;  %v759_v53 = vmul.f32 0.2, %v757_v41  ;;  %v302_v55 = vmul.f32 0.2, %v300_v45 }
 0x2c5   :  { %570 = vmax.xlane.f32.xlu2 %v569_v54  ;;  %v507_v25 = vsel %vm311_vm2, %v2304_v32, -inf  ;;  %v2318_v51 = vadd.f32 %v631_v40, %v151_v11  ;;  %v2320_v54 = vadd.f32 %v696_v43, %v151_v11 }
 0x2c6   :  { %635 = vmax.xlane.f32.xlu1 %v634_v58  ;;  %v572_v42 = vsel %vm311_vm2, %v2308_v14, -inf  ;;  %v761_v9 = vmax.f32 %v757_v41, %v759_v53  ;;  %v304_v60 = vmax.f32 %v300_v45, %v302_v55 }
 0x2c7   :  { %v637_v58 = vsel %vm311_vm2, %v2318_v51, -inf  ;;  %v702_v59 = vsel %vm311_vm2, %v2320_v54, -inf }
 0x2c8   :  { %v297_v57 = vpop.permute.xlu2 %296  ;;  %v2326_v20 = vadd.f32 %v761_v9, %v151_v11  ;;  %v2329_v3 = vadd.f32 %v304_v60, %v2236_v24 }
 0x2c9   :  { %v301_v31 = vadd.f32 %v299_v39, %v297_v57 }
 0x2ca   :  { %v767_v4 = vsel %vm311_vm2, %v2326_v20, -inf  ;;  %v308_v7 = vsel %vm79_vm0, %v2329_v3, -inf }
 0x2cb   :  { %v303_v1 = vmul.f32 0.2, %v301_v31 }
 0x2cd   :  { %700 = vmax.xlane.f32.xlu2 %v699_v5  ;;  %v305_v5 = vmax.f32 %v301_v31, %v303_v1 }
 0x2ce   :  { %765 = vmax.xlane.f32.xlu1 %v764_v12 }
 0x2cf   :  { %v2335_v8 = vadd.f32 %v305_v5, %v151_v11 }
 0x2d1   :  { %1738 = vrot.lane.b32.xlu0 %v2284_v18, %s1961_s4  ;;  %v312_v12 = vsel %vm311_vm2, %v2335_v8, -inf }
 0x2d5   :  { %378 = vmax.xlane.f32.xlu2 %v377_v13 }
 0x2d6   :  { %443 = vmax.xlane.f32.xlu1 %v442_v27 }
 0x2d9   :  { %1743 = vrot.lane.b32.xlu0 %v2302_v30, %s1962_s7 }
 0x2dd   :  { %508 = vmax.xlane.f32.xlu2 %v507_v25 }
 0x2de   :  { %573 = vmax.xlane.f32.xlu1 %v572_v42 }
 0x2e5   :  { %638 = vmax.xlane.f32.xlu2 %v637_v58 }
 0x2e6   :  { %703 = vmax.xlane.f32.xlu1 %v702_v59 }
 0x2ed   :  { %768 = vmax.xlane.f32.xlu2 %v767_v4 }
 0x2ee   :  { %309 = vmax.xlane.f32.xlu1 %v308_v7 }
 0x2f5   :  { %313 = vmax.xlane.f32.xlu2 %v312_v12 }
 0x330   :  { %v441_v15 = vpop.xlane.xlu2 %440  ;;  %v506_v16 = vpop.xlane.xlu0 %505 }
 0x331   :  { %v445_v24 = vsub.f32 %v2244_v34, %v441_v15  ;;  %v376_v17 = vpop.xlane.xlu1 %375  ;;  %v510_v22 = vsub.f32 %v2241_v33, %v506_v16 }
 0x332   :  { %v380_v21 = vsub.f32 %v2247_v35, %v376_v17 }
 0x333   :  { %v447_v10 = vmul.f32 1.442695, %v445_v24  ;;  %v512_v23 = vmul.f32 1.442695, %v510_v22 }
 0x334   :  { %v382_v13 = vmul.f32 1.442695, %v380_v21 }
 0x335   :  { %1818 = vpow2.f32 %v447_v10 }
 0x336   :  { %1820 = vpow2.f32 %v382_v13 }
 0x337   :  { %1822 = vpow2.f32 %v512_v23 }
 0x338   :  { %v571_v11 = vpop.xlane.xlu2 %570 }
 0x339   :  { %v575_v26 = vsub.f32 %v2260_v44, %v571_v11  ;;  %v636_v27 = vpop.xlane.xlu1 %635 }
 0x33a   :  { %v640_v34 = vsub.f32 %v2263_v50, %v636_v27 }
 0x33b   :  { %v577_v28 = vmul.f32 1.442695, %v575_v26  ;;  %v2343_v29 = vpop.eup %1818 }
 0x33c   :  { %v2346_v36 = vpop.eup %1820  ;;  %v451_v33 = vsel %vm79_vm0, %v2343_v29, 0.0  ;;  %v642_v37 = vmul.f32 1.442695, %v640_v34 }
 0x33d   :  { %1824 = vpow2.f32 %v577_v28  ;;  %452 = vadd.xlane.f32.xlu2 %v451_v33  ;;  %v386_v35 = vsel %vm79_vm0, %v2346_v36, 0.0  ;;  %v2353_v25 = vpop.eup %1822 }
 0x33e   :  { %387 = vadd.xlane.f32.xlu1 %v386_v35  ;;  %1826 = vpow2.f32 %v642_v37  ;;  %v516_v43 = vsel %vm79_vm0, %v2353_v25, 0.0 }
 0x340   :  { %v701_v44 = vpop.xlane.xlu2 %700 }
 0x341   :  { %v705_v38 = vsub.f32 %v2270_v0, %v701_v44  ;;  %v766_v39 = vpop.xlane.xlu1 %765 }
 0x342   :  { %v770_v41 = vsub.f32 %v2273_v2, %v766_v39 }
 0x343   :  { %v2355_v40 = vpop.eup %1824  ;;  %v707_v50 = vmul.f32 1.442695, %v705_v38 }
 0x344   :  { %v581_v42 = vsel %vm79_vm0, %v2355_v40, 0.0  ;;  %v772_v45 = vmul.f32 1.442695, %v770_v41  ;;  %v2363_v57 = vpop.eup %1826 }
 0x345   :  { %1828 = vpow2.f32 %v707_v50  ;;  %582 = vadd.xlane.f32.xlu2 %v581_v42  ;;  %v646_v59 = vsel %vm79_vm0, %v2363_v57, 0.0 }
 0x346   :  { %517 = vadd.xlane.f32.xlu1 %v516_v43  ;;  %1830 = vpow2.f32 %v772_v45 }
 0x348   :  { %v379_v0 = vpop.xlane.xlu2 %378 }
 0x349   :  { %v381_v53 = vsub.f32 %v2286_v19, %v379_v0  ;;  %v444_v55 = vpop.xlane.xlu1 %443 }
 0x34a   :  { %v446_v2 = vsub.f32 %v2290_v6, %v444_v55 }
 0x34b   :  { %v2365_v58 = vpop.eup %1828  ;;  %v384_v9 = vmul.f32 1.442695, %v381_v53 }
 0x34c   :  { %v711_v31 = vsel %vm79_vm0, %v2365_v58, 0.0  ;;  %v449_v60 = vmul.f32 1.442695, %v446_v2  ;;  %v2373_v5 = vpop.eup %1830 }
 0x34d   :  { %1832 = vpow2.f32 %v384_v9  ;;  %712 = vadd.xlane.f32.xlu2 %v711_v31  ;;  %v776_v16 = vsel %vm79_vm0, %v2373_v5, 0.0 }
 0x34e   :  { %647 = vadd.xlane.f32.xlu1 %v646_v59  ;;  %1834 = vpow2.f32 %v449_v60 }
 0x350   :  { %v509_v19 = vpop.xlane.xlu2 %508 }
 0x351   :  { %v511_v1 = vsub.f32 %v2304_v32, %v509_v19  ;;  %v574_v4 = vpop.xlane.xlu1 %573 }
 0x352   :  { %v576_v6 = vsub.f32 %v2308_v14, %v574_v4 }
 0x353   :  { %v2375_v7 = vpop.eup %1832  ;;  %v514_v12 = vmul.f32 1.442695, %v511_v1 }
 0x354   :  { %v389_v15 = vsel %vm311_vm2, %v2375_v7, 0.0  ;;  %v579_v24 = vmul.f32 1.442695, %v576_v6  ;;  %v2383_v10 = vpop.eup %1834 }
 0x355   :  { %1836 = vpow2.f32 %v514_v12  ;;  %390 = vadd.xlane.f32.xlu2 %v389_v15  ;;  %v454_v11 = vsel %vm311_vm2, %v2383_v10, 0.0 }
 0x356   :  { %777 = vadd.xlane.f32.xlu1 %v776_v16  ;;  %1838 = vpow2.f32 %v579_v24 }
 0x358   :  { %v639_v32 = vpop.xlane.xlu2 %638 }
 0x359   :  { %v641_v17 = vsub.f32 %v2318_v51, %v639_v32  ;;  %v704_v21 = vpop.xlane.xlu1 %703 }
 0x35a   :  { %v706_v23 = vsub.f32 %v2320_v54, %v704_v21 }
 0x35b   :  { %v2385_v22 = vpop.eup %1836  ;;  %v644_v13 = vmul.f32 1.442695, %v641_v17 }
 0x35c   :  { %v519_v14 = vsel %vm311_vm2, %v2385_v22, 0.0  ;;  %v709_v26 = vmul.f32 1.442695, %v706_v23  ;;  %v2392_v27 = vpop.eup %1838 }
 0x35d   :  { %1840 = vpow2.f32 %v644_v13  ;;  %520 = vadd.xlane.f32.xlu2 %v519_v14  ;;  %v584_v54 = vsel %vm311_vm2, %v2392_v27, 0.0 }
 0x35e   :  { %455 = vadd.xlane.f32.xlu1 %v454_v11  ;;  %1842 = vpow2.f32 %v709_v26 }
 0x360   :  { %v769_v39 = vpop.xlane.xlu2 %768 }
 0x361   :  { %v310_v51 = vpop.xlane.xlu1 %309  ;;  %v771_v43 = vsub.f32 %v2326_v20, %v769_v39 }
 0x362   :  { %v315_v28 = vsub.f32 %v2329_v3, %v310_v51 }
 0x363   :  { %v2395_v34 = vpop.eup %1840  ;;  %v774_v45 = vmul.f32 1.442695, %v771_v43 }
 0x364   :  { %v317_v33 = vmul.f32 1.442695, %v315_v28  ;;  %v649_v35 = vsel %vm311_vm2, %v2395_v34, 0.0  ;;  %v2401_v37 = vpop.eup %1842 }
 0x365   :  { %650 = vadd.xlane.f32.xlu2 %v649_v35  ;;  %v714_v38 = vsel %vm311_vm2, %v2401_v37, 0.0 }
 0x366   :  { %1844 = vpow2.f32 %v317_v33  ;;  %585 = vadd.xlane.f32.xlu1 %v584_v54 }
 0x368   :  { %v314_v50 = vpop.xlane.xlu2 %313 }
 0x369   :  { %v316_v41 = vsub.f32 %v2335_v8, %v314_v50 }
 0x36b   :  { %v319_v42 = vmul.f32 1.442695, %v316_v41 }
 0x36c   :  { %v2403_v44 = vpop.eup %1844 }
 0x36d   :  { %v321_v3 = vsel %vm79_vm0, %v2403_v44, 0.0  ;;  %1846 = vpow2.f32 %v319_v42 }
 0x36e   :  { %322 = vadd.xlane.f32.xlu0 %v321_v3  ;;  %715 = vadd.xlane.f32.xlu1 %v714_v38  ;;  %1848 = vpow2.f32 %v774_v45 }
 0x373   :  { %v2419_v0 = vpop.eup %1846 }
 0x374   :  { %v324_v55 = vsel %vm311_vm2, %v2419_v0, 0.0  ;;  %v2423_v9 = vpop.eup %1848 }
 0x37d   :  { %1733 = vrot.lane.b32.xlu2 %v2284_v18, %s1963_s21 }
 0x385   :  { %1748 = vrot.lane.b32.xlu2 %v2302_v30, %s1963_s21 }
 0x387   :  { %1728 = vrot.lane.b32.xlu1 %v2284_v18, %s1962_s7 }
 0x38d   :  { %1753 = vrot.lane.b32.xlu2 %v2302_v30, %s1961_s4  ;;  %v779_v30 = vsel %vm311_vm2, %v2423_v9, 0.0 }
 0x3b0   :  { %v453_v53 = vpop.xlane.xlu2 %452 }
 0x3b1   :  { %325 = vadd.xlane.f32.xlu1 %v324_v55  ;;  %v388_v18 = vpop.xlane.xlu1 %387  ;;  %1850 = vrcp.f32 %v453_v53  ;;  %v466_v32 = vand.u32 2147483647, %v453_v53  ;;  %v468_v13 = vand.u32 2147483648, %v453_v53  ;;  %vm462_vm3 = vweird.f32 %v453_v53 }
 0x3b2   :  { %1852 = vrcp.f32 %v388_v18  ;;  %v401_v23 = vand.u32 2147483647, %v388_v18  ;;  %v403_v26 = vand.u32 2147483648, %v388_v18  ;;  %vm397_vm4 = vweird.f32 %v388_v18 }
 0x3b3   :  { %vm2461_vm6 = vcmp.eq.f32.partialorder %v466_v32, 8.507059e+37  ;;  %v469_v54 = vor.u32 1.1754944e-38, %v468_v13 }
 0x3b4   :  { %vm2467_vm8 = vcmp.eq.f32.partialorder %v401_v23, 8.507059e+37  ;;  %v404_v50 = vor.u32 1.1754944e-38, %v403_v26 }
 0x3b6   :  { %780 = vadd.xlane.f32.xlu2 %v779_v30 }
 0x3b7   :  { %v2431_v2 = vpop.eup %1850 }
 0x3b8   :  { %v2427_v20 = vpop.xlane.xlu2 %582  ;;  %v2433_v31 = vpop.eup %1852  ;;  %v458_v59 = vmul.f32 %v2431_v2, %v453_v53  ;;  %vm463_vm5 = vweird.f32 %v2431_v2 }
 0x3b9   :  { %v2429_v8 = vpop.xlane.xlu1 %517  ;;  %v393_v19 = vmul.f32 %v2433_v31, %v388_v18  ;;  %vm398_vm7 = vweird.f32 %v2433_v31  ;;  %vm592_vm9 = vweird.f32 %v2427_v20  ;;  %v596_v41 = vand.u32 2147483647, %v2427_v20  ;;  %vm2479_vm10 = vmor %vm462_vm3, %vm463_vm5 }
 0x3ba   :  { %1854 = vrcp.f32 %v2429_v8  ;;  %v459_v12 = vsub.f32 1.0, %v458_v59  ;;  %v598_v42 = vand.u32 2147483648, %v2427_v20  ;;  %vm527_vm11 = vweird.f32 %v2429_v8  ;;  %vm2488_vm12 = vmor %vm397_vm4, %vm398_vm7 }
 0x3bb   :  { %1856 = vrcp.f32 %v2427_v20  ;;  %v394_v15 = vsub.f32 1.0, %v393_v19  ;;  %v531_v30 = vand.u32 2147483647, %v2429_v8 }
 0x3bc   :  { %v460_v24 = vmul.f32 %v2431_v2, %v459_v12 }
 0x3bd   :  { %v395_v14 = vmul.f32 %v2433_v31, %v394_v15  ;;  %vm2534_vm3 = vcmp.eq.f32.partialorder %v531_v30, 8.507059e+37 }
 0x3be   :  { %v461_v28 = vadd.f32 %v2431_v2, %v460_v24 }
 0x3bf   :  { %v396_v3 = vadd.f32 %v2433_v31, %v395_v14 }
 0x3c0   :  { %v2438_v60 = vpop.xlane.xlu2 %712  ;;  %v2443_v4 = vpop.eup %1854  ;;  %v465_v15 = vsel %vm2479_vm10, %v2431_v2, %v461_v28 }
 0x3c1   :  { %v2441_v1 = vpop.xlane.xlu1 %647  ;;  %v2445_v6 = vpop.eup %1856  ;;  %v523_v16 = vmul.f32 %v2443_v4, %v2429_v8  ;;  %v400_v32 = vsel %vm2488_vm12, %v2433_v31, %v396_v3  ;;  %vm528_vm14 = vweird.f32 %v2443_v4  ;;  %v470_v23 = vsel %vm2461_vm6, %v469_v54, %v465_v15 }
 0x3c2   :  { %v588_v17 = vmul.f32 %v2445_v6, %v2427_v20  ;;  %1858 = vrcp.f32 %v2441_v1  ;;  %vm593_vm13 = vweird.f32 %v2445_v6  ;;  %v663_v14 = vand.u32 2147483648, %v2441_v1  ;;  %vm2543_vm4 = vmor %vm527_vm11, %vm528_vm14 }
 0x3c3   :  { %v524_v51 = vsub.f32 1.0, %v523_v16  ;;  %v533_v16 = vand.u32 2147483648, %v2429_v8  ;;  %vm2530_vm2 = vmor %vm592_vm9, %vm593_vm13  ;;  %v2551_v30 = vmul.f32 %v2343_v29, %v470_v23  ;;  %vm657_vm6 = vweird.f32 %v2441_v1 }
 0x3c4   :  { %v589_v35 = vsub.f32 1.0, %v588_v17  ;;  %v2511_v17 = vor.u32 1.1754944e-38, %v598_v42  ;;  %v661_v29 = vand.u32 2147483647, %v2441_v1 }
 0x3c5   :  { %v525_v55 = vmul.f32 %v2443_v4, %v524_v51  ;;  %v405_v51 = vsel %vm2467_vm8, %v404_v50, %v400_v32  ;;  %v534_v54 = vor.u32 1.1754944e-38, %v533_v16 }
 0x3c6   :  { %v590_v19 = vmul.f32 %v2445_v6, %v589_v35 }
 0x3c7   :  { %v526_v2 = vadd.f32 %v2443_v4, %v525_v55 }
 0x3c8   :  { %v2453_v21 = vpop.xlane.xlu2 %390  ;;  %v2471_v39 = vpop.eup %1858  ;;  %v2520_v26 = vadd.f32 %v2445_v6, %v590_v19  ;;  %v2556_v19 = vor.u32 1.1754944e-38, %v663_v14 }
 0x3c9   :  { %1860 = vrcp.f32 %v2453_v21  ;;  %v2457_v11 = vpop.xlane.xlu1 %777  ;;  %v653_v18 = vmul.f32 %v2471_v39, %v2441_v1  ;;  %v417_v42 = vand.u32 2147483648, %v2453_v21  ;;  %vm411_vm5 = vweird.f32 %v2453_v21 }
 0x3ca   :  { %1862 = vrcp.f32 %v2438_v60  ;;  %v415_v55 = vand.u32 2147483647, %v2453_v21  ;;  %vm658_vm11 = vweird.f32 %v2471_v39 }
 0x3cb   :  { %1864 = vrcp.f32 %v2457_v11  ;;  %v654_v3 = vsub.f32 1.0, %v653_v18 }
 0x3cc   :  { %vm416_vm8 = vcmp.eq.f32.partialorder %v415_v55, 8.507059e+37 }
 0x3cf   :  { %v2476_v43 = vpop.eup %1860 }
 0x3d0   :  { %v407_v53 = vmul.f32 %v2476_v43, %v2453_v21  ;;  %v2496_v12 = vpop.xlane.xlu2 %520  ;;  %vm412_vm15 = vweird.f32 %v2476_v43  ;;  %v2526_v28 = vpop.eup %1862  ;;  %v530_v21 = vsel %vm2543_vm4, %v2443_v4, %v526_v2  ;;  %v595_v4 = vsel %vm2530_vm2, %v2445_v6, %v2520_v26 }
 0x3d1   :  { %1866 = vrcp.f32 %v2496_v12  ;;  %v2505_v24 = vpop.xlane.xlu1 %455  ;;  %v2539_v45 = vpop.eup %1864  ;;  %vm2560_vm7 = vmor %vm411_vm5, %vm412_vm15  ;;  %v2573_v16 = vmul.f32 %v2526_v28, %v2438_v60  ;;  %v418_v2 = vor.u32 1.1754944e-38, %v417_v42  ;;  %v547_v55 = vand.u32 2147483648, %v2496_v12 }
 0x3d2   :  { %v408_v13 = vsub.f32 1.0, %v407_v53  ;;  %1868 = vrcp.f32 %v2505_v24  ;;  %v420_v53 = vmul.f32 %v2346_v36, %v405_v51  ;;  %v2597_v51 = vmul.f32 %v2539_v45, %v2457_v11  ;;  %vm2633_vm15 = vmor %vm657_vm6, %vm658_vm11 }
 0x3d3   :  { %vm541_vm10 = vweird.f32 %v2496_v12  ;;  %vm476_vm13 = vweird.f32 %v2505_v24  ;;  %vm788_vm2 = vweird.f32 %v2539_v45 }
 0x3d4   :  { %v409_v31 = vmul.f32 %v2476_v43, %v408_v13  ;;  %v655_v13 = vmul.f32 %v2471_v39, %v654_v3  ;;  %v545_v3 = vand.u32 2147483647, %v2496_v12 }
 0x3d6   :  { %v410_v50 = vadd.f32 %v2476_v43, %v409_v31  ;;  %vm2621_vm14 = vcmp.eq.f32.partialorder %v545_v3, 8.507059e+37 }
 0x3d7   :  { %v2553_v59 = vpop.eup %1866 }
 0x3d8   :  { %v2569_v15 = vpop.eup %1868  ;;  %v537_v18 = vmul.f32 %v2553_v59, %v2496_v12  ;;  %v2577_v32 = vpop.xlane.xlu2 %650  ;;  %v414_v36 = vsel %vm2560_vm7, %v2476_v43, %v410_v50  ;;  %v535_v43 = vsel %vm2534_vm3, %v534_v54, %v530_v21  ;;  %vm542_vm9 = vweird.f32 %v2553_v59 }
 0x3d9   :  { %v472_v14 = vmul.f32 %v2569_v15, %v2505_v24  ;;  %1870 = vrcp.f32 %v2577_v32  ;;  %v2590_v23 = vpop.xlane.xlu1 %585  ;;  %v419_v38 = vsel %vm416_vm8, %v418_v2, %v414_v36  ;;  %v2607_v54 = vadd.f32 %v2471_v39, %v655_v13  ;;  %vm2615_vm12 = vmor %vm541_vm10, %vm542_vm9 }
 0x3da   :  { %v538_v31 = vsub.f32 1.0, %v537_v18  ;;  %1872 = vrcp.f32 %v2590_v23  ;;  %v421_v8 = vmul.f32 %v2375_v7, %v419_v38  ;;  %v480_v18 = vand.u32 2147483647, %v2505_v24 }
 0x3db   :  { %v473_v42 = vsub.f32 1.0, %v472_v14  ;;  %v482_v36 = vand.u32 2147483648, %v2505_v24  ;;  %v784_v7 = vsub.f32 1.0, %v2597_v51  ;;  %v550_v13 = vmul.f32 %v2353_v25, %v535_v43 }
 0x3dc   :  { %v539_v50 = vmul.f32 %v2553_v59, %v538_v31  ;;  %v1757_v2 = vpack.i.bf16 %v421_v8, %v420_v53  ;;  %v719_v31 = vsub.f32 1.0, %v2573_v16  ;;  %vm2639_vm3 = vcmp.eq.f32.partialorder %v596_v41, 8.507059e+37 }
 0x3dd   :  { %v474_v33 = vmul.f32 %v2569_v15, %v473_v42  ;;  %vm477_vm4 = vweird.f32 %v2569_v15  ;;  %vm2652_vm5 = vcmp.eq.f32.partialorder %v480_v18, 8.507059e+37  ;;  %v483_v20 = vor.u32 1.1754944e-38, %v482_v36 }
 0x3de   :  { %v540_v21 = vadd.f32 %v2553_v59, %v539_v50  ;;  %v548_v50 = vor.u32 1.1754944e-38, %v547_v55  ;;  %1758 = vrot.lane.b32.xlu0 %v1757_v2, %s1964_s22  ;;  %v660_v55 = vsel %vm2633_vm15, %v2471_v39, %v2607_v54  ;;  %v612_v2 = vand.u32 2147483648, %v2590_v23  ;;  %vm478_vm6 = vmor %vm476_vm13, %vm477_vm4 }
 0x3df   :  { %v1871_v14 = vpop.eup %1870  ;;  %v475_v51 = vadd.f32 %v2569_v15, %v474_v33  ;;  %v677_v33 = vand.u32 2147483648, %v2577_v32  ;;  %v675_v18 = vand.u32 2147483647, %v2577_v32  ;;  %vm671_vm9 = vweird.f32 %v2577_v32 }
 0x3e0   :  { %v1873_v42 = vpop.eup %1872  ;;  %v667_v53 = vmul.f32 %v1871_v14, %v2577_v32  ;;  %v544_v16 = vsel %vm2615_vm12, %v2553_v59, %v540_v21  ;;  %vm672_vm7 = vweird.f32 %v1871_v14  ;;  %vm606_vm10 = vweird.f32 %v2590_v23 }
 0x3e1   :  { %v602_v59 = vmul.f32 %v1873_v42, %v2590_v23  ;;  %v2646_v3 = vpop.xlane.xlu1 %715  ;;  %v549_v12 = vsel %vm2621_vm14, %v548_v50, %v544_v16  ;;  %vm607_vm8 = vweird.f32 %v1873_v42  ;;  %v479_v25 = vsel %vm478_vm6, %v2569_v15, %v475_v51  ;;  %vm673_vm11 = vmor %vm671_vm9, %vm672_vm7 }
 0x3e2   :  { %v668_v41 = vsub.f32 1.0, %v667_v53  ;;  %1874 = vrcp.f32 %v2646_v3  ;;  %v551_v54 = vmul.f32 %v2385_v22, %v549_v12  ;;  %v610_v53 = vand.u32 2147483647, %v2590_v23  ;;  %vm608_vm12 = vmor %vm606_vm10, %vm607_vm8 }
 0x3e3   :  { %v603_v21 = vsub.f32 1.0, %v602_v59  ;;  %v484_v38 = vsel %vm2652_vm5, %v483_v20, %v479_v25  ;;  %v678_v50 = vor.u32 1.1754944e-38, %v677_v33  ;;  %v613_v15 = vor.u32 1.1754944e-38, %v612_v2  ;;  %v1739_v25 = vpop.permute.xlu0 %1738 }
 0x3e4   :  { %v669_v39 = vmul.f32 %v1871_v14, %v668_v41  ;;  %v1767_v59 = vpack.i.bf16 %v551_v54, %v550_v13  ;;  %v486_v22 = vmul.f32 %v2383_v10, %v484_v38  ;;  %vm676_vm13 = vcmp.eq.f32.partialorder %v675_v18, 8.507059e+37 }
 0x3e5   :  { %v604_v36 = vmul.f32 %v1873_v42, %v603_v21  ;;  %v785_v21 = vmul.f32 %v2539_v45, %v784_v7  ;;  %vm611_vm14 = vcmp.eq.f32.partialorder %v610_v53, 8.507059e+37  ;;  %vm662_vm15 = vcmp.eq.f32.partialorder %v661_v29, 8.507059e+37 }
 0x3e6   :  { %v670_v24 = vadd.f32 %v1871_v14, %v669_v39  ;;  %1768 = vrot.lane.b32.xlu2 %v1767_v59, %s1965_s23  ;;  %v1762_v13 = vpack.i.bf16 %v486_v22, %v2551_v30  ;;  %v600_v10 = vsel %vm2639_vm3, %v2511_v17, %v595_v4  ;;  %v720_v7 = vmul.f32 %v2526_v28, %v719_v31 }
 0x3e7   :  { %v605_v16 = vadd.f32 %v1873_v42, %v604_v36  ;;  %v786_v6 = vadd.f32 %v2539_v45, %v785_v21  ;;  %v793_v17 = vand.u32 2147483648, %v2457_v11  ;;  %v615_v26 = vmul.f32 %v2355_v40, %v600_v10 }
 0x3e8   :  { %v2672_v41 = vpop.eup %1874  ;;  %v674_v32 = vsel %vm673_vm11, %v1871_v14, %v670_v24  ;;  %1763 = vrot.lane.b32.xlu0 %v1762_v13, %s1962_s7  ;;  %vm787_vm3 = vweird.f32 %v2457_v11  ;;  %v791_v29 = vand.u32 2147483647, %v2457_v11  ;;  %vm723_vm5 = vweird.f32 %v2526_v28 }
 0x3e9   :  { %v679_v51 = vsel %vm676_vm13, %v678_v50, %v674_v32  ;;  %v609_v8 = vsel %vm608_vm12, %v1873_v42, %v605_v16  ;;  %v732_v30 = vmul.f32 %v2672_v41, %v2646_v3  ;;  %vm789_vm4 = vmor %vm787_vm3, %vm788_vm2  ;;  %v728_v31 = vand.u32 2147483648, %v2438_v60 }
 0x3ea   :  { %v681_v23 = vmul.f32 %v2395_v34, %v679_v51  ;;  %v614_v14 = vsel %vm611_vm14, %v613_v15, %v609_v8  ;;  %v665_v34 = vsel %vm662_vm15, %v2556_v19, %v660_v55  ;;  %v790_v42 = vsel %vm789_vm4, %v2539_v45, %v786_v6 }
 0x3eb   :  { %v616_v1 = vmul.f32 %v2392_v27, %v614_v14  ;;  %v680_v35 = vmul.f32 %v2363_v57, %v665_v34  ;;  %v733_v4 = vsub.f32 1.0, %v732_v30  ;;  %v721_v27 = vadd.f32 %v2526_v28, %v720_v7  ;;  %v1744_v22 = vpop.permute.xlu0 %1743 }
 0x3ec   :  { %848 = vrot.lane.b32.xlu1 %v681_v23, %s1966_s24  ;;  %vm722_vm6 = vweird.f32 %v2438_v60  ;;  %v794_v40 = vor.u32 1.1754944e-38, %v793_v17  ;;  %v726_v43 = vand.u32 2147483647, %v2438_v60  ;;  %vm792_vm7 = vcmp.eq.f32.partialorder %v791_v29, 8.507059e+37 }
 0x3ed   :  { %v1772_v19 = vpack.i.bf16 %v616_v1, %v615_v26  ;;  %vm724_vm8 = vmor %vm722_vm6, %vm723_vm5  ;;  %v734_v57 = vmul.f32 %v2672_v41, %v733_v4  ;;  %v729_v20 = vor.u32 1.1754944e-38, %v728_v31  ;;  %vm737_vm10 = vweird.f32 %v2672_v41 }
 0x3ee   :  { %846 = vrot.lane.b32.xlu2 %v680_v35, %s1966_s24  ;;  %v795_v11 = vsel %vm792_vm7, %v794_v40, %v790_v42  ;;  %v725_v55 = vsel %vm724_vm8, %v2526_v28, %v721_v27  ;;  %vm727_vm9 = vcmp.eq.f32.partialorder %v726_v43, 8.507059e+37  ;;  %v742_v60 = vand.u32 2147483648, %v2646_v3 }
 0x3ef   :  { %v810_v33 = vmul.f32 %v2373_v5, %v795_v11  ;;  %v730_v2 = vsel %vm727_vm9, %v729_v20, %v725_v55  ;;  %v735_v45 = vadd.f32 %v2672_v41, %v734_v57  ;;  %vm736_vm11 = vweird.f32 %v2646_v3  ;;  %v1734_v5 = vpop.permute.xlu2 %1733 }
 0x3f0   :  { %1773 = vrot.lane.b32.xlu0 %v1772_v19, %s1963_s21  ;;  %v745_v12 = vmul.f32 %v2365_v58, %v730_v2  ;;  %v740_v28 = vand.u32 2147483647, %v2646_v3  ;;  %vm738_vm12 = vmor %vm736_vm11, %vm737_vm10  ;;  %v743_v36 = vor.u32 1.1754944e-38, %v742_v60  ;;  %v1735_v38 = vunpack.i.l.bf16 %v1734_v5 }
 0x3f1   :  { %v739_v18 = vsel %vm738_vm12, %v2672_v41, %v735_v45  ;;  %v1736_v58 = vunpack.i.h.bf16 %v1734_v5  ;;  %v1740_v3 = vunpack.i.l.bf16 %v1739_v25  ;;  %v1741_v50 = vunpack.i.h.bf16 %v1739_v25 }
 0x3f2   :  { %vm741_vm13 = vcmp.eq.f32.partialorder %v740_v28, 8.507059e+37  ;;  %v1745_v41 = vunpack.i.l.bf16 %v1744_v22  ;;  %v1746_v21 = vunpack.i.h.bf16 %v1744_v22  ;;  %vm872_vm8 = vcmask 392192  }
 0x3f3   :  { %v744_v59 = vsel %vm741_vm13, %v743_v36, %v739_v18  ;;  %vm875_vm9 = vcmask 523264   ;;  %vm878_vm10 = vcmask 654336   ;;  %vm881_vm11 = vcmask 785408  }
 0x3f4   :  { %v746_v24 = vmul.f32 %v2401_v37, %v744_v59  ;;  %vm884_vm12 = vcmask 916480  }
 0x3f6   :  { %862 = vrot.lane.b32.xlu2 %v810_v33, %s1967_s25 }
 0x3f7   :  { %v1749_v16 = vpop.permute.xlu2 %1748 }
 0x3f8   :  { %854 = vrot.lane.b32.xlu0 %v745_v12, %s1961_s4  ;;  %v1750_v15 = vunpack.i.l.bf16 %v1749_v16  ;;  %v1751_v37 = vunpack.i.h.bf16 %v1749_v16 }
 0x3f9   :  { %v1729_v39 = vpop.permute.xlu1 %1728 }
 0x3fa   :  { %v1730_v54 = vunpack.i.l.bf16 %v1729_v39  ;;  %v1731_v53 = vunpack.i.h.bf16 %v1729_v39 }
 0x3fc   :  { %927 = vmatpush.msrb.mxu1 %v1730_v54 }
 0x3fe   :  { %928 = vmatpush.msrb.mxu1 %v1731_v53 }
 0x3ff   :  { %v1754_v32 = vpop.permute.xlu2 %1753 }
 0x400   :  { %929 = vmatpush.msrb.mxu1 %v1735_v38  ;;  %856 = vrot.lane.b32.xlu0 %v746_v24, %s1961_s4  ;;  %v1755_v13 = vunpack.i.l.bf16 %v1754_v32  ;;  %v1756_v51 = vunpack.i.h.bf16 %v1754_v32 }
 0x402   :  { %930 = vmatpush.msrb.mxu1 %v1736_v58 }
 0x404   :  { %931 = vmatpush.msrb.mxu1 %v1740_v3 }
 0x406   :  { %932 = vmatpush.msrb.mxu1 %v1741_v50 }
 0x408   :  { %933 = vmatpush.msrb.mxu1 %v2207_v49 }
 0x40a   :  { %934 = vmatpush.msrb.mxu1 %v2201_v47 }
 0x40c   :  { %935 = vmatpush.msrb.mxu1 %v1745_v41 }
 0x40e   :  { %936 = vmatpush.msrb.mxu1 %v1746_v21 }
 0x410   :  { %937 = vmatpush.msrb.mxu1 %v1750_v15 }
 0x412   :  { %938 = vmatpush.msrb.mxu1 %v1751_v37 }
 0x414   :  { %939 = vmatpush.msrb.mxu1 %v1755_v13 }
 0x416   :  { %940 = vmatpush.msrb.mxu1 %v1756_v51 }
 0x418   :  { %941 = vmatpush.msrb.mxu1 %v2204_v48 }
 0x41a   :  { %942 = vmatpush.msrb.mxu1 %v2198_v46  ;;  %v323_v46 = vpop.xlane.xlu0 %322 }
 0x41b   :  { %v338_v27 = vand.u32 2147483648, %v323_v46  ;;  %vm332_vm5 = vweird.f32 %v323_v46  ;;  %v336_v42 = vand.u32 2147483647, %v323_v46 }
 0x41d   :  { %v339_v57 = vor.u32 1.1754944e-38, %v338_v27  ;;  %vm337_vm7 = vcmp.eq.f32.partialorder %v336_v42, 8.507059e+37  ;;  %v974_v42 = vld [vmem:[%s3110_s8 + $0x38] sm:$0xff] }
 0x424   :  { %v326_v54 = vpop.xlane.xlu1 %325 }
 0x425   :  { %v352_v50 = vand.u32 2147483648, %v326_v54  ;;  %v350_v16 = vand.u32 2147483647, %v326_v54 }
 0x427   :  { %v353_v41 = vor.u32 1.1754944e-38, %v352_v50  ;;  %v1006_v50 = vld [vmem:[%s3111_s9 + $0xf8] sm:$0xff] }
 0x428   :  { %1084 = vmatpush.msra.mxu0 %v1006_v50 }
 0x429   :  { %v781_v49 = vpop.xlane.xlu2 %780 }
 0x42a   :  { %1876 = vrcp.f32 %v781_v49  ;;  %v807_v10 = vand.u32 2147483648, %v781_v49  ;;  %v805_v7 = vand.u32 2147483647, %v781_v49  ;;  %vm801_vm15 = vweird.f32 %v781_v49 }
 0x42b   :  { %1878 = vrcp.f32 %v323_v46 }
 0x42c   :  { %v808_v34 = vor.u32 1.1754944e-38, %v807_v10  ;;  %vm806_vm3 = vcmp.eq.f32.partialorder %v805_v7, 8.507059e+37  ;;  %1880 = vrcp.f32 %v326_v54 }
 0x430   :  { %v1877_v47 = vpop.eup %1876 }
 0x431   :  { %v797_v8 = vmul.f32 %v1877_v47, %v781_v49  ;;  %vm802_vm14 = vweird.f32 %v1877_v47  ;;  %v1879_v17 = vpop.eup %1878 }
 0x432   :  { %vm803_vm2 = vmor %vm801_vm15, %vm802_vm14  ;;  %v328_v26 = vmul.f32 %v1879_v17, %v323_v46  ;;  %vm333_vm4 = vweird.f32 %v1879_v17  ;;  %v1881_v59 = vpop.eup %1880  ;;  %vm346_vm14 = vweird.f32 %v326_v54  ;;  %v967_v46 = vld [vmem:[%s3110_s8] sm:$0xff] }
 0x433   :  { %v798_v23 = vsub.f32 1.0, %v797_v8  ;;  %vm334_vm6 = vmor %vm332_vm5, %vm333_vm4  ;;  %v342_v38 = vmul.f32 %v1881_v59, %v326_v54  ;;  %vm347_vm13 = vweird.f32 %v1881_v59  ;;  %vm1454_vm4 = vcmask 1043456  }
 0x434   :  { %v329_v35 = vsub.f32 1.0, %v328_v26  ;;  %vm348_vm15 = vmor %vm346_vm14, %vm347_vm13  ;;  %vm1156_vm5 = vcmask 97280  }
 0x435   :  { %v799_v14 = vmul.f32 %v1877_v47, %v798_v23  ;;  %v343_v58 = vsub.f32 1.0, %v342_v38  ;;  %v978_v38 = vld [vmem:[%s3111_s9 + $0x18] sm:$0xff] }
 0x436   :  { %v330_v4 = vmul.f32 %v1879_v17, %v329_v35 }
 0x437   :  { %v800_v30 = vadd.f32 %v1877_v47, %v799_v14  ;;  %v344_v24 = vmul.f32 %v1881_v59, %v343_v58  ;;  %v977_v58 = vld [vmem:[%s3111_s9 + $0x10] sm:$0xff] }
 0x438   :  { %v331_v19 = vadd.f32 %v1879_v17, %v330_v4 }
 0x439   :  { %v804_v1 = vsel %vm803_vm2, %v1877_v47, %v800_v30  ;;  %v345_v3 = vadd.f32 %v1881_v59, %v344_v24  ;;  %vm351_vm2 = vcmp.eq.f32.partialorder %v350_v16, 8.507059e+37  ;;  %v976_v24 = vld [vmem:[%s3111_s9 + $0x8] sm:$0xff]  ;;  %v1005_v16 = vld [vmem:[%s3111_s9 + $0xf0] sm:$0xff] }
 0x43a   :  { %v809_v6 = vsel %vm806_vm3, %v808_v34, %v804_v1  ;;  %v335_v40 = vsel %vm334_vm6, %v1879_v17, %v331_v19  ;;  %v1816_v17 = vld [vmem:[%s3108_s6] ss:$0 sm:$0xff]  ;;  %1085 = vmatpush.msra.mxu0 %v1005_v16 }
 0x43b   :  { %v811_v48 = vmul.f32 %v2423_v9, %v809_v6  ;;  %v340_v9 = vsel %vm337_vm7, %v339_v57, %v335_v40  ;;  %v349_v22 = vsel %vm348_vm15, %v1881_v59, %v345_v3  ;;  %v971_v6 = vld [vmem:[%s3110_s8 + $0x20] sm:$0xff]  ;;  %v972_v40 = vld [vmem:[%s3110_s8 + $0x28] sm:$0xff] }
 0x43c   :  { %v355_v20 = vmul.f32 %v2403_v44, %v340_v9  ;;  %v354_v21 = vsel %vm351_vm2, %v353_v41, %v349_v22  ;;  %v968_v57 = vld [vmem:[%s3110_s8 + $0x8] sm:$0xff]  ;;  %v979_v59 = vld [vmem:[%s3111_s9 + $0x20] sm:$0xff] }
 0x43d   :  { %864 = vrot.lane.b32.xlu2 %v811_v48, %s1967_s25  ;;  %v356_v37 = vmul.f32 %v2419_v0, %v354_v21  ;;  %v973_v0 = vld [vmem:[%s3110_s8 + $0x30] sm:$0xff]  ;;  %v975_v3 = vld [vmem:[%s3111_s9] sm:$0xff]  ;;  %v1004_v22 = vld [vmem:[%s3111_s9 + $0xe8] sm:$0xff] }
 0x43e   :  { %1027 = vmatpush.msrb.mxu2 %v973_v0  ;;  %v969_v48 = vld [vmem:[%s3110_s8 + $0x10] sm:$0xff]  ;;  %v1003_v41 = vld [vmem:[%s3111_s9 + $0xe0] sm:$0xff]  ;;  %1086 = vmatpush.msra.mxu0 %v1004_v22  ;;  %v1002_v21 = vld [vmem:[%s3111_s9 + $0xd8] sm:$0xff] }
 0x440   :  { %v1769_v31 = vpop.permute.xlu2 %1768  ;;  %1028 = vmatpush.msrb.mxu2 %v971_v6  ;;  %1087 = vmatpush.msra.mxu0 %v1003_v41 }
 0x441   :  { %v1770_v39 = vunpack.i.l.bf16 %v1769_v31  ;;  %v1771_v47 = vunpack.i.h.bf16 %v1769_v31 }
 0x442   :  { %1029 = vmatpush.msrb.mxu2 %v969_v48  ;;  %1088 = vmatpush.msra.mxu0 %v1002_v21 }
 0x444   :  { %1030 = vmatpush.msrb.mxu2 %v967_v46 }
 0x446   :  { %1050 = vmatpush.msra.mxu2 %v974_v42 }
 0x448   :  { %v847_v33 = vpop.permute.xlu2 %846  ;;  %1051 = vmatpush.msra.mxu2 %v972_v40 }
 0x450   :  { %v1759_v29 = vpop.permute.xlu0 %1758  ;;  %v863_v36 = vpop.permute.xlu2 %862 }
 0x451   :  { %v1760_v11 = vunpack.i.l.bf16 %v1759_v29  ;;  %v1761_v15 = vunpack.i.h.bf16 %v1759_v29 }
 0x453   :  { %v868_v2 = vsel %vm79_vm0, %v355_v20, %v1760_v11  ;;  %v869_v13 = vsel %vm79_vm0, %v356_v37, %v1761_v15  ;;  %v989_v20 = vld [vmem:[%s3111_s9 + $0x70] sm:$0xff]  ;;  %v999_v37 = vld [vmem:[%s3111_s9 + $0xc0] sm:$0xff] }
 0x454   :  { %v1001_v15 = vld [vmem:[%s3111_s9 + $0xd0] sm:$0xff] }
 0x455   :  { %1089 = vmatpush.msra.mxu0 %v1001_v15 }
 0x45a   :  { %v1764_v43 = vpop.permute.xlu0 %1763 }
 0x45b   :  { %v1765_v55 = vunpack.i.l.bf16 %v1764_v43  ;;  %v1766_v32 = vunpack.i.h.bf16 %v1764_v43  ;;  %v970_v43 = vld [vmem:[%s3110_s8 + $0x18] sm:$0xff]  ;;  %s1679_s8 = sld [smem:[#allocation7 + $0x1]] }
 0x45c   :  { %1052 = vmatpush.msra.mxu2 %v970_v43 }
 0x45d   :  { %v870_v60 = vsel %vm152_vm1, %v868_v2, %v1765_v55  ;;  %v871_v51 = vsel %vm152_vm1, %v869_v13, %v1766_v32  ;;  %v990_v55 = vld [vmem:[%s3111_s9 + $0x78] sm:$0xff]  ;;  %v988_v2 = vld [vmem:[%s3111_s9 + $0x68] sm:$0xff] }
 0x45e   :  { %v873_v28 = vsel %vm872_vm8, %v870_v60, %v1770_v39  ;;  %v874_v8 = vsel %vm872_vm8, %v871_v51, %v1771_v47  ;;  %v849_v14 = vpop.permute.xlu1 %848  ;;  %1053 = vmatpush.msra.mxu2 %v968_v57  ;;  %1061 = vmatpush.msrb.mxu3 %v990_v55  ;;  %v987_v60 = vld [vmem:[%s3111_s9 + $0x60] sm:$0xff]  ;;  %v985_v39 = vld [vmem:[%s3111_s9 + $0x50] sm:$0xff]  ;;  %v1000_v32 = vld [vmem:[%s3111_s9 + $0xc8] sm:$0xff] }
 0x45f   :  { %1090 = vmatpush.msra.mxu0 %v1000_v32  ;;  %v998_v13 = vld [vmem:[%s3111_s9 + $0xb8] sm:$0xff]  ;;  %v997_v51 = vld [vmem:[%s3111_s9 + $0xb0] sm:$0xff] }
 0x460   :  { %1062 = vmatpush.msrb.mxu3 %v989_v20 }
 0x461   :  { %1091 = vmatpush.msra.mxu0 %v999_v37 }
 0x462   :  { %v1774_v45 = vpop.permute.xlu0 %1773  ;;  %1063 = vmatpush.msrb.mxu3 %v988_v2 }
 0x463   :  { %v1775_v12 = vunpack.i.l.bf16 %v1774_v45  ;;  %v1776_v49 = vunpack.i.h.bf16 %v1774_v45  ;;  %1092 = vmatpush.msra.mxu0 %v998_v13 }
 0x464   :  { %1064 = vmatpush.msrb.mxu3 %v987_v60 }
 0x465   :  { %v876_v5 = vsel %vm875_vm9, %v873_v28, %v1775_v12  ;;  %v877_v23 = vsel %vm875_vm9, %v874_v8, %v1776_v49  ;;  %v986_v12 = vld [vmem:[%s3111_s9 + $0x58] sm:$0xff]  ;;  %v984_v28 = vld [vmem:[%s3111_s9 + $0x48] sm:$0xff]  ;;  %1093 = vmatpush.msra.mxu0 %v997_v51  ;;  %v995_v8 = vld [vmem:[%s3111_s9 + $0xa0] sm:$0xff] }
 0x466   :  { %v879_v18 = vsel %vm878_vm10, %v876_v5, %v847_v33  ;;  %v880_v7 = vsel %vm878_vm10, %v877_v23, %v849_v14  ;;  %1065 = vmatpush.msrb.mxu3 %v986_v12  ;;  %v983_v5 = vld [vmem:[%s3111_s9 + $0x40] sm:$0xff]  ;;  %v996_v49 = vld [vmem:[%s3111_s9 + $0xa8] sm:$0xff]  ;;  %v994_v23 = vld [vmem:[%s3111_s9 + $0x98] sm:$0xff] }
 0x467   :  { %1094 = vmatpush.msra.mxu0 %v996_v49  ;;  %v992_v14 = vld [vmem:[%s3111_s9 + $0x88] sm:$0xff] }
 0x468   :  { %1066 = vmatpush.msrb.mxu3 %v985_v39 }
 0x469   :  { %1095 = vmatpush.msra.mxu0 %v995_v8 }
 0x46a   :  { %v855_v44 = vpop.permute.xlu0 %854  ;;  %1067 = vmatpush.msrb.mxu3 %v984_v28 }
 0x46b   :  { %v882_v53 = vsel %vm881_vm11, %v879_v18, %v855_v44  ;;  %v982_v18 = vld [vmem:[%s3111_s9 + $0x38] sm:$0xff]  ;;  %1096 = vmatpush.msra.mxu0 %v994_v23 }
 0x46c   :  { %v885_v25 = vsel %vm884_vm12, %v882_v53, %v863_v36  ;;  %1068 = vmatpush.msrb.mxu3 %v983_v5  ;;  %v981_v53 = vld [vmem:[%s3111_s9 + $0x30] sm:$0xff]  ;;  %v1008_v5 = vld [vmem:[%s3113_s11] sm:$0xff]  ;;  %s1968_s11 = smov 24  }
 0x46d   :  { %943 = vmatmul.f32.vlgmr.msrb.gmra.mxu1 %v885_v25  ;;  %v980_v25 = vld [vmem:[%s3111_s9 + $0x28] sm:$0xff] }
 0x46e   :  { %1069 = vmatpush.msrb.mxu3 %v982_v18 }
 0x470   :  { %1070 = vmatpush.msrb.mxu3 %v981_v53 }
 0x472   :  { %v857_v10 = vpop.permute.xlu0 %856  ;;  %1071 = vmatpush.msrb.mxu3 %v980_v25 }
 0x473   :  { %v883_v30 = vsel %vm881_vm11, %v880_v7, %v857_v10  ;;  %v993_v10 = vld [vmem:[%s3111_s9 + $0x90] sm:$0xff]  ;;  %v991_v7 = vld [vmem:[%s3111_s9 + $0x80] sm:$0xff]  ;;  %s1681_s9 = sld [smem:[#allocation7 + $0x2]] }
 0x474   :  { %1072 = vmatpush.msrb.mxu3 %v979_v59  ;;  %1097 = vmatpush.msra.mxu0 %v993_v10 }
 0x476   :  { %1073 = vmatpush.msrb.mxu3 %v978_v38  ;;  %1098 = vmatpush.msra.mxu0 %v992_v14 }
 0x478   :  { %1074 = vmatpush.msrb.mxu3 %v977_v58  ;;  %1099 = vmatpush.msra.mxu0 %v991_v7 }
 0x47a   :  { %1075 = vmatpush.msrb.mxu3 %v976_v24 }
 0x47c   :  { %1076 = vmatpush.msrb.mxu3 %v975_v3 }
 0x497   :  { %v865_v34 = vpop.permute.xlu2 %864 }
 0x498   :  { %v886_v1 = vsel %vm884_vm12, %v883_v30, %v865_v34 }
 0x499   :  { %946 = vmatmul.f32.gmra.mxu1 %v886_v1 }
 0x4ea   :  { %v944_v26 = vpop.f32.mrf.mxu1 }
 0x4eb   :  { %v950_v35 = vmul.f32 0.125, %v944_v26 }
 0x4ed   :  { %v955_v29 = vadd.f32 %v1816_v17, %v950_v35 }
 0x4ef   :  { %v959_v4 = vmul.f32 1.442695, %v955_v29  ;;  %vm957_vm0 = vcmp.gt.f32.partialorder %v955_v29, 0.0 }
 0x4f1   :  { %1882 = vpow2.f32 %v959_v4 }
 0x4f7   :  { %v1883_v19 = vpop.eup %1882 }
 0x4f8   :  { %v1670_v27 = vadd.f32 -1.0, %v1883_v19 }
 0x4fa   :  { %v965_v31 = vsel %vm957_vm0, %v955_v29, %v1670_v27 }
 0x4fb   :  { %1672 = vmatmul.msk.f32.vlgmr.msrb.gmra.mxu2 %vm152_vm1, %v965_v31 }
 0x516   :  { %v947_v9 = vpop.f32.mrf.mxu1 }
 0x517   :  { %v951_v11 = vmul.f32 0.125, %v947_v9 }
 0x519   :  { %v956_v33 = vadd.f32 %v1816_v17, %v951_v11 }
 0x51b   :  { %v961_v45 = vmul.f32 1.442695, %v956_v33  ;;  %vm958_vm3 = vcmp.gt.f32.partialorder %v956_v33, 0.0 }
 0x51d   :  { %1884 = vpow2.f32 %v961_v45 }
 0x523   :  { %v1885_v54 = vpop.eup %1884 }
 0x524   :  { %v1671_v44 = vadd.f32 -1.0, %v1885_v54 }
 0x526   :  { %v966_v36 = vsel %vm958_vm3, %v956_v33, %v1671_v44 }
 0x527   :  { %1673 = vmatmul.msk.f32.gmra.mxu2 %vm152_vm1, %v966_v36 }
 0x52f   :  { %1674 = vmatmul.msk.f32.vlgmr.msra.gmra.mxu2 %vm152_vm1, %v965_v31 }
 0x537   :  { %1675 = vmatmul.msk.f32.gmra.mxu2 %vm152_vm1, %v966_v36 }
 0x57e   :  { %v2856_v47 = vpop.f32.mrf.mxu2 }
 0x57f   :  { %1077 = vmatmul.f32.vlgmr.msrb.gmra.mxu3 %v2856_v47  ;;  %v1455_v34 = vrot.slane %v2856_v47, 4 }
 0x5aa   :  { %v2874_v30 = vpop.f32.mrf.mxu2 }
 0x5ab   :  { %v1456_v1 = vrot.slane %v2874_v30, 4  ;;  %1080 = vmatmul.f32.gmra.mxu3 %v2874_v30 }
 0x5ad   :  { %v1457_v0 = vsel %vm1454_vm4, %v1455_v34, %v1456_v1 }
 0x5ae   :  { %v2880_v6 = vpack.i.bf16 %v1455_v34, %v1457_v0 }
 0x5b2   :  { %v2882_v48 = vpop.f32.mrf.mxu2 }
 0x5b3   :  { %1100 = vmatmul.f32.vlgmr.msra.gmra.mxu0 %v2882_v48 }
 0x5ba   :  { %v2885_v46 = vpop.f32.mrf.mxu2 }
 0x5bb   :  { %1103 = vmatmul.f32.gmra.mxu0 %v2885_v46 }
 0x602   :  { %v1078_v17 = vpop.f32.mrf.mxu3 }
 0x62e   :  { %v1081_v4 = vpop.f32.mrf.mxu3 }
 0x630   :  { %v1101_v26 = vpop.f32.mrf.mxu0 }
 0x631   :  { %v1102_v35 = vadd.f32 %v1101_v26, %v1078_v17  ;;  %v1479_v26 = vrot.slane %v2885_v46, 4 }
 0x633   :  { %1248 = vperm.xlu1 %1779, %v1102_v35   ;;  %1215 = vperm.xlu2 %1778, %v1102_v35  }
 0x634   :  { %1109 = vrot.lane.b32.xlu0 %v1102_v35, %s1955_s5 }
 0x638   :  { %v1104_v29 = vpop.f32.mrf.mxu0 }
 0x639   :  { %v1105_v19 = vadd.f32 %v1104_v29, %v1081_v4  ;;  %v1790_v29 = vpack.i.bf16 %v2882_v48, %v2885_v46 }
 0x63b   :  { %1781 = vset.pattern.permute.xlu1 %v1954_v52  ;;  %1780 = vset.pattern.permute.xlu2 %v1956_v56 }
 0x63c   :  { %1182 = vperm.xlu0 %1777, %v1102_v35   ;;  %1314 = vperm.xlu1 %1781, %v1102_v35  }
 0x63d   :  { %1281 = vperm.xlu2 %1780, %v1102_v35  }
 0x644   :  { %1782 = vset.pattern.permute.xlu0 %v1959_v62 }
 0x645   :  { %1783 = vset.pattern.permute.xlu2 %v1958_v61  ;;  %1347 = vperm.xlu0 %1782, %v1102_v35  }
 0x646   :  { %1380 = vperm.xlu2 %1783, %v1102_v35  }
 0x64d   :  { %1815 = vset.pattern.permute.xlu0 %v1958_v61 }
 0x64e   :  { %1784 = vset.pattern.permute.xlu2 %v1960_v63 }
 0x64f   :  { %1148 = vperm.xlu2 %1784, %v1102_v35   ;;  %v1478_v35 = vrot.slane %v2882_v48, 4 }
 0x651   :  { %v1480_v4 = vsel %vm1454_vm4, %v1478_v35, %v1479_v26 }
 0x657   :  { %1111 = vrot.lane.b32.xlu2 %v1105_v19, %s1955_s5  ;;  %v1785_v19 = vpack.i.bf16 %v1478_v35, %v1480_v4  ;;  %s1537_s5 = sld [smem:[#allocation5]] }
 0x68d   :  { %v1216_v52 = vpop.permute.xlu2 %1215 }
 0x697   :  { %v1282_v56 = vpop.permute.xlu2 %1281 }
 0x6a0   :  { %v1381_v27 = vpop.permute.xlu2 %1380 }
 0x6a5   :  { %v1249_v40 = vpop.permute.xlu1 %1248 }
 0x6a6   :  { %v1110_v31 = vpop.permute.xlu0 %1109 }
 0x6a7   :  { %1115 = vxpose.xlu1.b32.start [1/2] (short) (narrow) %v1110_v31, 8 }
 0x6a9   :  { %v2896_v62 = vpop.permute.xlu2 %1148 }
 0x6ae   :  { %v1315_v43 = vpop.permute.xlu1 %1314  ;;  %v1183_v61 = vpop.permute.xlu0 %1182 }
 0x6b1   :  { %v1112_v42 = vpop.permute.xlu2 %1111 }
 0x6b2   :  { %1116 = vxpose.xlu1.b32.end [2/2] (short) (narrow) %v1112_v42, 8 }
 0x6b7   :  { %v1348_v58 = vpop.permute.xlu0 %1347 }
 0x74e   :  { %v2898_v57 = vpop.trf.xlu1 }
 0x74f   :  { %v1383_v63 = vperm.slane %v2898_v57, 7  ;;  %v1218_v9 = vperm.slane %v2898_v57, 2  ;;  %v1185_v11 = vperm.slane %v2898_v57, 1  ;;  %v1284_v55 = vperm.slane %v2898_v57, 4 }
 0x750   :  { %v1251_v20 = vperm.slane %v2898_v57, 3  ;;  %v1350_v44 = vperm.slane %v2898_v57, 6  ;;  %v1317_v38 = vperm.slane %v2898_v57, 5 }
 0x751   :  { %v1384_v33 = vadd.f32 %v1383_v63, %v1381_v27  ;;  %v1219_v2 = vadd.f32 %v1218_v9, %v1216_v52  ;;  %v1186_v45 = vadd.f32 %v1185_v11, %v1183_v61  ;;  %v1285_v60 = vadd.f32 %v1284_v55, %v1282_v56 }
 0x752   :  { %v1252_v12 = vadd.f32 %v1251_v20, %v1249_v40  ;;  %v1351_v16 = vadd.f32 %v1350_v44, %v1348_v58  ;;  %v1318_v37 = vadd.f32 %v1317_v38, %v1315_v43  ;;  %v1805_v52 = vpack.i.bf16 %v2856_v47, %v2874_v30 }
 0x753   :  { %v1385_v39 = vmul.f32 0.2, %v1384_v33  ;;  %v1220_v28 = vmul.f32 0.2, %v1219_v2  ;;  %v1187_v54 = vmul.f32 0.2, %v1186_v45 }
 0x754   :  { %v1286_v25 = vmul.f32 0.2, %v1285_v60  ;;  %v1253_v59 = vmul.f32 0.2, %v1252_v12  ;;  %v1352_v51 = vmul.f32 0.2, %v1351_v16 }
 0x755   :  { %v1386_v18 = vmax.f32 %v1384_v33, %v1385_v39  ;;  %v1221_v36 = vmax.f32 %v1219_v2, %v1220_v28  ;;  %v1188_v53 = vmax.f32 %v1186_v45, %v1187_v54  ;;  %v1319_v8 = vmul.f32 0.2, %v1318_v37 }
 0x756   :  { %v1287_v15 = vmax.f32 %v1285_v60, %v1286_v25  ;;  %v1254_v32 = vmax.f32 %v1252_v12, %v1253_v59  ;;  %v1353_v10 = vmax.f32 %v1351_v16, %v1352_v51  ;;  %v1151_v56 = vperm.slane %v2898_v57, 0 }
 0x757   :  { %v2910_v24 = vadd.f32 %v1386_v18, %v1008_v5  ;;  %v1222_v3 = vadd.f32 %v1221_v36, %v1008_v5  ;;  %v1189_v50 = vadd.f32 %v1188_v53, %v1008_v5  ;;  %v1320_v7 = vmax.f32 %v1318_v37, %v1319_v8 }
 0x758   :  { %v1288_v13 = vadd.f32 %v1287_v15, %v1008_v5  ;;  %v1255_v49 = vadd.f32 %v1254_v32, %v1008_v5  ;;  %v1354_v34 = vadd.f32 %v1353_v10, %v1008_v5  ;;  %v1152_v27 = vadd.f32 %v1151_v56, %v2896_v62 }
 0x759   :  { %v1388_v22 = vsel %vm1156_vm5, %v2910_v24, -inf  ;;  %v1223_v41 = vsel %vm1156_vm5, %v1222_v3, -inf  ;;  %v1190_v21 = vsel %vm1156_vm5, %v1189_v50, -inf  ;;  %v1321_v1 = vadd.f32 %v1320_v7, %v1008_v5 }
 0x75a   :  { %1389 = vmax.xlane.f32.xlu1 %v1388_v22  ;;  %1224 = vmax.xlane.f32.xlu2 %v1223_v41  ;;  %v1289_v23 = vsel %vm1156_vm5, %v1288_v13, -inf  ;;  %v1256_v14 = vsel %vm1156_vm5, %v1255_v49, -inf  ;;  %v1355_v0 = vsel %vm1156_vm5, %v1354_v34, -inf  ;;  %v1153_v31 = vmul.f32 0.2, %v1152_v27 }
 0x75b   :  { %1191 = vmax.xlane.f32.xlu0 %v1190_v21  ;;  %v1322_v17 = vsel %vm1156_vm5, %v1321_v1, -inf }
 0x75c   :  { %v1154_v42 = vmax.f32 %v1152_v27, %v1153_v31 }
 0x75e   :  { %v2935_v40 = vadd.f32 %v1154_v42, %v1008_v5 }
 0x760   :  { %v1157_v43 = vsel %vm1156_vm5, %v2935_v40, -inf }
 0x762   :  { %1290 = vmax.xlane.f32.xlu2 %v1289_v23 }
 0x763   :  { %1257 = vmax.xlane.f32.xlu0 %v1256_v14 }
 0x76a   :  { %1356 = vmax.xlane.f32.xlu2 %v1355_v0 }
 0x76b   :  { %1323 = vmax.xlane.f32.xlu0 %v1322_v17 }
 0x77f   :  { %1791 = vrot.lane.b32.xlu0 %v1790_v29, %s1963_s21 }
 0x782   :  { %1786 = vrot.lane.b32.xlu2 %v1785_v19, %s1962_s7 }
 0x787   :  { %1801 = vrot.lane.b32.xlu0 %v2880_v6, %s1962_s7  ;;  %s1970_s7 = smov 36  }
 0x78a   :  { %1796 = vrot.lane.b32.xlu2 %v1785_v19, %s1961_s4 }
 0x792   :  { %1806 = vrot.lane.b32.xlu2 %v1805_v52, %s1963_s21  ;;  %s1971_s21 = smov 72  }
 0x7b1   :  { %1158 = vmax.xlane.f32.xlu0 %v1157_v43 }
 0x7cd   :  { %v1225_v61 = vpop.xlane.xlu2 %1224  ;;  %v1390_v36 = vpop.xlane.xlu1 %1389 }
 0x7ce   :  { %v1226_v63 = vsub.f32 %v1222_v3, %v1225_v61  ;;  %v1192_v9 = vpop.xlane.xlu0 %1191 }
 0x7cf   :  { %v1193_v11 = vsub.f32 %v1189_v50, %v1192_v9  ;;  %v1391_v50 = vsub.f32 %v2910_v24, %v1390_v36 }
 0x7d0   :  { %v1227_v55 = vmul.f32 1.442695, %v1226_v63 }
 0x7d1   :  { %v1194_v20 = vmul.f32 1.442695, %v1193_v11  ;;  %v1392_v41 = vmul.f32 1.442695, %v1391_v50 }
 0x7d2   :  { %1886 = vpow2.f32 %v1227_v55 }
 0x7d3   :  { %1888 = vpow2.f32 %v1194_v20 }
 0x7d5   :  { %v1291_v33 = vpop.xlane.xlu2 %1290 }
 0x7d6   :  { %v1292_v57 = vsub.f32 %v1288_v13, %v1291_v33  ;;  %v1258_v2 = vpop.xlane.xlu0 %1257 }
 0x7d7   :  { %v1259_v62 = vsub.f32 %v1255_v49, %v1258_v2 }
 0x7d8   :  { %v1293_v45 = vmul.f32 1.442695, %v1292_v57  ;;  %v2939_v60 = vpop.eup %1886 }
 0x7d9   :  { %v1260_v12 = vmul.f32 1.442695, %v1259_v62  ;;  %v2941_v39 = vpop.eup %1888  ;;  %v1229_v28 = vsel %vm1156_vm5, %v2939_v60, 0.0 }
 0x7da   :  { %1890 = vpow2.f32 %v1293_v45  ;;  %v1196_v54 = vsel %vm1156_vm5, %v2941_v39, 0.0  ;;  %1230 = vadd.xlane.f32.xlu0 %v1229_v28 }
 0x7db   :  { %1892 = vpow2.f32 %v1260_v12  ;;  %1197 = vadd.xlane.f32.xlu2 %v1196_v54 }
 0x7dd   :  { %v1357_v5 = vpop.xlane.xlu2 %1356 }
 0x7de   :  { %v1358_v44 = vsub.f32 %v1354_v34, %v1357_v5  ;;  %v1324_v18 = vpop.xlane.xlu0 %1323 }
 0x7df   :  { %v1325_v53 = vsub.f32 %v1321_v1, %v1324_v18 }
 0x7e0   :  { %v2947_v25 = vpop.eup %1890  ;;  %v1359_v59 = vmul.f32 1.442695, %v1358_v44 }
 0x7e1   :  { %v2949_v38 = vpop.eup %1892  ;;  %v1326_v58 = vmul.f32 1.442695, %v1325_v53  ;;  %v1295_v3 = vsel %vm1156_vm5, %v2947_v25, 0.0 }
 0x7e2   :  { %1894 = vpow2.f32 %v1359_v59  ;;  %v1262_v16 = vsel %vm1156_vm5, %v2949_v38, 0.0  ;;  %1296 = vadd.xlane.f32.xlu0 %v1295_v3 }
 0x7e3   :  { %1896 = vpow2.f32 %v1326_v58  ;;  %1263 = vadd.xlane.f32.xlu2 %v1262_v16 }
 0x7e4   :  { %1898 = vpow2.f32 %v1392_v41 }
 0x7e5   :  { %v1787_v22 = vpop.permute.xlu2 %1786 }
 0x7e6   :  { %v1788_v21 = vunpack.i.l.bf16 %v1787_v22  ;;  %v1789_v8 = vunpack.i.h.bf16 %v1787_v22 }
 0x7e8   :  { %v2956_v15 = vpop.eup %1894  ;;  %1510 = vmatpush.msra.mxu1 %v1788_v21 }
 0x7e9   :  { %v2958_v32 = vpop.eup %1896  ;;  %v1361_v37 = vsel %vm1156_vm5, %v2956_v15, 0.0 }
 0x7ea   :  { %v1328_v24 = vsel %vm1156_vm5, %v2958_v32, 0.0  ;;  %1362 = vadd.xlane.f32.xlu0 %v1361_v37  ;;  %v2964_v13 = vpop.eup %1898 }
 0x7eb   :  { %1329 = vadd.xlane.f32.xlu2 %v1328_v24  ;;  %v1394_v10 = vsel %vm1156_vm5, %v2964_v13, 0.0 }
 0x7ed   :  { %v1797_v51 = vpop.permute.xlu2 %1796 }
 0x7ee   :  { %v1799_v34 = vunpack.i.h.bf16 %v1797_v51  ;;  %v1798_v1 = vunpack.i.l.bf16 %v1797_v51 }
 0x7f0   :  { %v1501_v17 = vsel %vm1454_vm4, %v2885_v46, %v1799_v34 }
 0x7f1   :  { %v1792_v49 = vpop.permute.xlu0 %1791 }
 0x7f2   :  { %v1793_v23 = vunpack.i.l.bf16 %v1792_v49  ;;  %v1794_v7 = vunpack.i.h.bf16 %v1792_v49 }
 0x7f3   :  { %1395 = vadd.xlane.f32.xlu2 %v1394_v10 }
 0x7f4   :  { %v1502_v14 = vsel %vm1454_vm4, %v1793_v23, %v1789_v8 }
 0x7f5   :  { %1511 = vmatpush.msra.mxu1 %v1502_v14  ;;  %v1807_v26 = vpop.permute.xlu2 %1806 }
 0x7f6   :  { %v1808_v4 = vunpack.i.l.bf16 %v1807_v26  ;;  %v1809_v52 = vunpack.i.h.bf16 %v1807_v26 }
 0x7f7   :  { %1512 = vmatpush.msra.mxu1 %v1794_v7 }
 0x7f9   :  { %v1802_v0 = vpop.permute.xlu0 %1801  ;;  %1513 = vmatpush.msra.mxu1 %v1798_v1 }
 0x7fa   :  { %v1804_v35 = vunpack.i.h.bf16 %v1802_v0  ;;  %v1803_v29 = vunpack.i.l.bf16 %v1802_v0 }
 0x7fb   :  { %1514 = vmatpush.msra.mxu1 %v1501_v17 }
 0x7fc   :  { %v1500_v19 = vsel %vm1454_vm4, %v1808_v4, %v1804_v35 }
 0x7fd   :  { %1515 = vmatpush.msra.mxu1 %v2882_v48 }
 0x7ff   :  { %1516 = vmatpush.msra.mxu1 %v1803_v29 }
 0x801   :  { %1517 = vmatpush.msra.mxu1 %v1500_v19 }
 0x803   :  { %1518 = vmatpush.msra.mxu1 %v1809_v52 }
 0x80b   :  { %1811 = vrot.lane.b32.xlu2 %v2880_v6, %s1961_s4  ;;  %s1969_s4 = smov 12  }
 0x824   :  { %v1159_v56 = vpop.xlane.xlu0 %1158 }
 0x825   :  { %v1160_v27 = vsub.f32 %v2935_v40, %v1159_v56 }
 0x827   :  { %v1161_v46 = vmul.f32 1.442695, %v1160_v27 }
 0x829   :  { %1900 = vpow2.f32 %v1161_v46 }
 0x82f   :  { %v2976_v31 = vpop.eup %1900 }
 0x830   :  { %v1163_v48 = vsel %vm1156_vm5, %v2976_v31, 0.0 }
 0x831   :  { %1164 = vadd.xlane.f32.xlu0 %v1163_v48 }
 0x84d   :  { %v1231_v42 = vpop.xlane.xlu0 %1230 }
 0x84e   :  { %v1198_v43 = vpop.xlane.xlu2 %1197  ;;  %1902 = vrcp.f32 %v1231_v42  ;;  %v1243_v2 = vand.u32 2147483648, %v1231_v42  ;;  %vm1237_vm7 = vweird.f32 %v1231_v42  ;;  %v1241_v12 = vand.u32 2147483647, %v1231_v42 }
 0x84f   :  { %1904 = vrcp.f32 %v1198_v43  ;;  %v1210_v62 = vand.u32 2147483648, %v1198_v43  ;;  %v1208_v5 = vand.u32 2147483647, %v1198_v43  ;;  %vm1204_vm12 = vweird.f32 %v1198_v43 }
 0x850   :  { %v1244_v58 = vor.u32 1.1754944e-38, %v1243_v2  ;;  %vm1242_vm14 = vcmp.eq.f32.partialorder %v1241_v12, 8.507059e+37 }
 0x851   :  { %v1211_v16 = vor.u32 1.1754944e-38, %v1210_v62  ;;  %vm1209_vm15 = vcmp.eq.f32.partialorder %v1208_v5, 8.507059e+37 }
 0x854   :  { %v1903_v61 = vpop.eup %1902 }
 0x855   :  { %v1905_v63 = vpop.eup %1904  ;;  %v1233_v9 = vmul.f32 %v1903_v61, %v1231_v42  ;;  %v2980_v11 = vpop.xlane.xlu0 %1296  ;;  %vm1238_vm6 = vweird.f32 %v1903_v61 }
 0x856   :  { %v1200_v6 = vmul.f32 %v1905_v63, %v1198_v43  ;;  %v1264_v55 = vpop.xlane.xlu2 %1263  ;;  %1906 = vrcp.f32 %v2980_v11  ;;  %vm1205_vm9 = vweird.f32 %v1905_v63  ;;  %vm2985_vm10 = vmor %vm1237_vm7, %vm1238_vm6  ;;  %vm1303_vm3 = vweird.f32 %v2980_v11 }
 0x857   :  { %v1234_v40 = vsub.f32 1.0, %v1233_v9  ;;  %1908 = vrcp.f32 %v1264_v55  ;;  %vm1206_vm13 = vmor %vm1204_vm12, %vm1205_vm9  ;;  %v1276_v24 = vand.u32 2147483648, %v1264_v55  ;;  %v1274_v10 = vand.u32 2147483647, %v1264_v55  ;;  %v1566_v9 = vld [vmem:[%s3114_s12 + $0x18] sm:$0xff] }
 0x858   :  { %v1201_v20 = vsub.f32 1.0, %v1200_v6  ;;  %vm1270_vm0 = vweird.f32 %v1264_v55 }
 0x859   :  { %v1235_v33 = vmul.f32 %v1903_v61, %v1234_v40  ;;  %v1277_v0 = vor.u32 1.1754944e-38, %v1276_v24  ;;  %vm1275_vm7 = vcmp.eq.f32.partialorder %v1274_v10, 8.507059e+37 }
 0x85a   :  { %v1202_v57 = vmul.f32 %v1905_v63, %v1201_v20 }
 0x85b   :  { %v1236_v45 = vadd.f32 %v1903_v61, %v1235_v33 }
 0x85c   :  { %v2983_v28 = vpop.eup %1906  ;;  %v1203_v54 = vadd.f32 %v1905_v63, %v1202_v57 }
 0x85d   :  { %v1909_v18 = vpop.eup %1908  ;;  %v1299_v36 = vmul.f32 %v2983_v28, %v2980_v11  ;;  %v2991_v53 = vpop.xlane.xlu0 %1362  ;;  %v1240_v59 = vsel %vm2985_vm10, %v1903_v61, %v1236_v45  ;;  %vm1304_vm9 = vweird.f32 %v2983_v28 }
 0x85e   :  { %v1266_v3 = vmul.f32 %v1909_v18, %v1264_v55  ;;  %v2995_v50 = vpop.xlane.xlu2 %1329  ;;  %1910 = vrcp.f32 %v2991_v53  ;;  %v1207_v21 = vsel %vm1206_vm13, %v1905_v63, %v1203_v54  ;;  %v1245_v37 = vsel %vm1242_vm14, %v1244_v58, %v1240_v59  ;;  %vm3023_vm13 = vmor %vm1303_vm3, %vm1304_vm9 }
 0x85f   :  { %v1300_v22 = vsub.f32 1.0, %v1299_v36  ;;  %1912 = vrcp.f32 %v2995_v50  ;;  %v1212_v51 = vsel %vm1209_vm15, %v1211_v16, %v1207_v21  ;;  %v1246_v49 = vmul.f32 %v2939_v60, %v1245_v37 }
 0x860   :  { %v1267_v41 = vsub.f32 1.0, %v1266_v3  ;;  %v1213_v23 = vmul.f32 %v2941_v39, %v1212_v51  ;;  %vm1271_vm2 = vweird.f32 %v1909_v18  ;;  %v1309_v60 = vand.u32 2147483648, %v2980_v11 }
 0x861   :  { %v1301_v14 = vmul.f32 %v2983_v28, %v1300_v22  ;;  %1417 = vrot.lane.b32.xlu2 %v1246_v49, %s1968_s11  ;;  %vm1272_vm6 = vmor %vm1270_vm0, %vm1271_vm2  ;;  %v1307_v39 = vand.u32 2147483647, %v2980_v11  ;;  %v1375_v19 = vand.u32 2147483648, %v2991_v53  ;;  %v1342_v27 = vand.u32 2147483648, %v2995_v50  ;;  %s1678_s11 = sld [smem:[#allocation5 + $0x1]] }
 0x862   :  { %v1268_v8 = vmul.f32 %v1909_v18, %v1267_v41  ;;  %1413 = vrot.lane.b32.xlu0 %v1213_v23, %s1969_s4  ;;  %v1340_v48 = vand.u32 2147483647, %v2995_v50  ;;  %v1373_v61 = vand.u32 2147483647, %v2991_v53  ;;  %v1310_v6 = vor.u32 1.1754944e-38, %v1309_v60  ;;  %s1680_s4 = sld [smem:[#allocation5 + $0x2]] }
 0x863   :  { %v1302_v52 = vadd.f32 %v2983_v28, %v1301_v14  ;;  %vm1369_vm14 = vweird.f32 %v2991_v53  ;;  %vm1336_vm15 = vweird.f32 %v2995_v50  ;;  %v1376_v40 = vor.u32 1.1754944e-38, %v1375_v19 }
 0x864   :  { %v1911_v7 = vpop.eup %1910  ;;  %v1269_v34 = vadd.f32 %v1909_v18, %v1268_v8  ;;  %vm1308_vm2 = vcmp.eq.f32.partialorder %v1307_v39, 8.507059e+37  ;;  %v1343_v33 = vor.u32 1.1754944e-38, %v1342_v27  ;;  %v1570_v27 = vld [vmem:[%s3115_s13 + $0x10] sm:$0xff] }
 0x865   :  { %v1913_v1 = vpop.eup %1912  ;;  %v1365_v17 = vmul.f32 %v1911_v7, %v2991_v53  ;;  %vm1370_vm10 = vweird.f32 %v1911_v7 }
 0x866   :  { %v1332_v26 = vmul.f32 %v1913_v1, %v2995_v50  ;;  %v3009_v35 = vpop.xlane.xlu2 %1395  ;;  %v1273_v29 = vsel %vm1272_vm6, %v1909_v18, %v1269_v34  ;;  %vm1337_vm12 = vweird.f32 %v1913_v1  ;;  %vm1371_vm0 = vmor %vm1369_vm14, %vm1370_vm10  ;;  %vm1341_vm6 = vcmp.eq.f32.partialorder %v1340_v48, 8.507059e+37  ;;  %v1568_v48 = vld [vmem:[%s3115_s13] sm:$0xff] }
 0x867   :  { %v1366_v4 = vsub.f32 1.0, %v1365_v17  ;;  %1914 = vrcp.f32 %v3009_v35  ;;  %v1278_v46 = vsel %vm1275_vm7, %v1277_v0, %v1273_v29  ;;  %vm1338_vm3 = vmor %vm1336_vm15, %vm1337_vm12  ;;  %vm1374_vm7 = vcmp.eq.f32.partialorder %v1373_v61, 8.507059e+37 }
 0x868   :  { %v1333_v56 = vsub.f32 1.0, %v1332_v26  ;;  %v1279_v43 = vmul.f32 %v2949_v38, %v1278_v46  ;;  %v1306_v38 = vsel %vm3023_vm13, %v2983_v28, %v1302_v52  ;;  %v1408_v59 = vand.u32 2147483648, %v3009_v35  ;;  %v1569_v46 = vld [vmem:[%s3115_s13 + $0x8] sm:$0xff] }
 0x869   :  { %v1367_v42 = vmul.f32 %v1911_v7, %v1366_v4  ;;  %v1311_v12 = vsel %vm1308_vm2, %v1310_v6, %v1306_v38  ;;  %v1406_v16 = vand.u32 2147483647, %v3009_v35  ;;  %vm1402_vm10 = vweird.f32 %v3009_v35  ;;  %v1565_v6 = vld [vmem:[%s3114_s12 + $0x10] sm:$0xff] }
 0x86a   :  { %v1334_v63 = vmul.f32 %v1913_v1, %v1333_v56  ;;  %1421 = vrot.lane.b32.xlu0 %v1279_v43, %s1970_s7  ;;  %v1312_v50 = vmul.f32 %v2947_v25, %v1311_v12  ;;  %s1543_s7 = scalar_lea.vmem [#allocation2], %s1542_s29 }
 0x86b   :  { %v1368_v55 = vadd.f32 %v1911_v7, %v1367_v42  ;;  %v1817_v42 = vld [vmem:[%s3112_s10] ss:$0 sm:$0xff] }
 0x86c   :  { %v1335_v20 = vadd.f32 %v1913_v1, %v1334_v63 }
 0x86d   :  { %v1915_v11 = vpop.eup %1914  ;;  %v1372_v57 = vsel %vm1371_vm0, %v1911_v7, %v1368_v55  ;;  %vm1441_vm0 = vcmask 195584   ;;  %v1564_v55 = vld [vmem:[%s3114_s12 + $0x8] sm:$0xff] }
 0x86e   :  { %v1398_v2 = vmul.f32 %v1915_v11, %v3009_v35  ;;  %v1812_v62 = vpop.permute.xlu2 %1811  ;;  %v1339_v45 = vsel %vm1338_vm3, %v1913_v1, %v1335_v20  ;;  %v1377_v28 = vsel %vm1374_vm7, %v1376_v40, %v1372_v57  ;;  %vm1403_vm9 = vweird.f32 %v1915_v11  ;;  %v1563_v40 = vld [vmem:[%s3114_s12] sm:$0xff]  ;;  %s1559_s12 = scalar_lea.vmem [#allocation2], %s1681_s9 }
 0x86f   :  { %v1814_v54 = vunpack.i.h.bf16 %v1812_v62  ;;  %v1813_v5 = vunpack.i.l.bf16 %v1812_v62  ;;  %v1344_v44 = vsel %vm1341_vm6, %v1343_v33, %v1339_v45  ;;  %v1378_v18 = vmul.f32 %v2956_v15, %v1377_v28  ;;  %vm1404_vm12 = vmor %vm1402_vm10, %vm1403_vm9 }
 0x870   :  { %v1399_v36 = vsub.f32 1.0, %v1398_v2  ;;  %v1345_v53 = vmul.f32 %v2958_v32, %v1344_v44  ;;  %v1409_v32 = vor.u32 1.1754944e-38, %v1408_v59  ;;  %vm1443_vm3 = vcmask 293888   ;;  %v1626_v44 = vld [vmem:[%s3116_s14 + $0x18] sm:$0xff] }
 0x871   :  { %1519 = vmatpush.msra.mxu1 %v1813_v5  ;;  %1433 = vrot.lane.b32.xlu1 %v1378_v18, %s1971_s21  ;;  %v1499_v58 = vsel %vm1454_vm4, %v2874_v30, %v1814_v54  ;;  %vm1407_vm4 = vcmp.eq.f32.partialorder %v1406_v16, 8.507059e+37  ;;  %vm1446_vm6 = vcmask 490496   ;;  %vm1448_vm7 = vcmask 588800   ;;  %s1551_s21 = scalar_lea.vmem [#allocation2], %s1679_s8  ;;  %v1625_v18 = vld [vmem:[%s3116_s14 + $0x10] sm:$0xff] }
 0x872   :  { %v1400_v3 = vmul.f32 %v1915_v11, %v1399_v36  ;;  %1429 = vrot.lane.b32.xlu2 %v1345_v53, %s1972_s30  ;;  %1425 = vrot.lane.b32.xlu0 %v1312_v50, %s1965_s23  ;;  %vm1450_vm9 = vcmask 687104   ;;  %s1538_s30 = scalar_lea.vmem [#allocation2], %s1537_s5  ;;  %s1555_s23 = scalar_lea.vmem [#allocation2], %s1680_s4  ;;  %v1624_v36 = vld [vmem:[%s3116_s14 + $0x8] sm:$0xff]  ;;  %v1623_v53 = vld [vmem:[%s3116_s14] sm:$0xff]  ;;  %vm1650_vm10 = vcmask 2048  }
 0x873   :  { %1520 = vmatpush.msra.mxu1 %v1499_v58 }
 0x874   :  { %v1401_v15 = vadd.f32 %v1915_v11, %v1400_v3 }
 0x875   :  { %1521 = vmatpush.msra.mxu1 %v2856_v47 }
 0x876   :  { %v1405_v22 = vsel %vm1404_vm12, %v1915_v11, %v1401_v15 }
 0x877   :  { %v1410_v30 = vsel %vm1407_vm4, %v1409_v32, %v1405_v22  ;;  %1642 = vmatpush.msrb.mxu1 %v1626_v44 }
 0x878   :  { %v1411_v41 = vmul.f32 %v2964_v13, %v1410_v30 }
 0x879   :  { %1643 = vmatpush.msrb.mxu1 %v1625_v18 }
 0x87a   :  { %1437 = vrot.lane.b32.xlu0 %v1411_v41, %s1973_s16  ;;  %s1547_s16 = scalar_lea.vmem [#allocation2], %s1678_s11 }
 0x87b   :  { %1644 = vmatpush.msrb.mxu1 %v1624_v36 }
 0x87d   :  { %1645 = vmatpush.msrb.mxu1 %v1623_v53 }
 0x8a4   :  { %v1165_v25 = vpop.xlane.xlu0 %1164 }
 0x8a5   :  { %1916 = vrcp.f32 %v1165_v25  ;;  %v1177_v23 = vand.u32 2147483648, %v1165_v25  ;;  %vm1171_vm14 = vweird.f32 %v1165_v25  ;;  %v1175_v47 = vand.u32 2147483647, %v1165_v25 }
 0x8a7   :  { %v1178_v14 = vor.u32 1.1754944e-38, %v1177_v23  ;;  %vm1176_vm2 = vcmp.eq.f32.partialorder %v1175_v47, 8.507059e+37 }
 0x8ab   :  { %v1917_v21 = vpop.eup %1916 }
 0x8ac   :  { %v1167_v37 = vmul.f32 %v1917_v21, %v1165_v25  ;;  %vm1172_vm13 = vweird.f32 %v1917_v21 }
 0x8ad   :  { %vm1173_vm15 = vmor %vm1171_vm14, %vm1172_vm13 }
 0x8ae   :  { %v1168_v24 = vsub.f32 1.0, %v1167_v37 }
 0x8b0   :  { %v1169_v51 = vmul.f32 %v1917_v21, %v1168_v24 }
 0x8b2   :  { %v1170_v8 = vadd.f32 %v1917_v21, %v1169_v51 }
 0x8b4   :  { %v1174_v10 = vsel %vm1173_vm15, %v1917_v21, %v1170_v8 }
 0x8b5   :  { %v1179_v7 = vsel %vm1176_vm2, %v1178_v14, %v1174_v10 }
 0x8b6   :  { %v1180_v34 = vmul.f32 %v2976_v31, %v1179_v7  ;;  %v1571_v31 = vld [vmem:[%s3115_s13 + $0x18] sm:$0xff] }
 0x8b7   :  { %1587 = vmatpush.msrb.mxu2 %v1571_v31 }
 0x8b9   :  { %1588 = vmatpush.msrb.mxu2 %v1570_v27 }
 0x8bb   :  { %v1418_v1 = vpop.permute.xlu2 %1417  ;;  %1589 = vmatpush.msrb.mxu2 %v1569_v46 }
 0x8bd   :  { %1590 = vmatpush.msrb.mxu2 %v1568_v48 }
 0x8bf   :  { %1610 = vmatpush.msra.mxu2 %v1566_v9 }
 0x8c1   :  { %1611 = vmatpush.msra.mxu2 %v1565_v6 }
 0x8c3   :  { %1612 = vmatpush.msra.mxu2 %v1564_v55 }
 0x8c5   :  { %1613 = vmatpush.msra.mxu2 %v1563_v40 }
 0x8cc   :  { %v1430_v35 = vpop.permute.xlu2 %1429 }
 0x8d4   :  { %v1414_v49 = vpop.permute.xlu0 %1413 }
 0x8d5   :  { %v1440_v0 = vsel %vm1156_vm5, %v1180_v34, %v1414_v49 }
 0x8d6   :  { %v1442_v60 = vsel %vm1441_vm0, %v1440_v0, %v1418_v1 }
 0x8dc   :  { %v1422_v13 = vpop.permute.xlu0 %1421 }
 0x8dd   :  { %v1444_v39 = vsel %vm1443_vm3, %v1442_v60, %v1422_v13 }
 0x8e3   :  { %v1434_v4 = vpop.permute.xlu1 %1433 }
 0x8e4   :  { %v1426_v17 = vpop.permute.xlu0 %1425 }
 0x8e5   :  { %v1445_v26 = vsel %vm872_vm8, %v1444_v39, %v1426_v17 }
 0x8e6   :  { %v1447_v29 = vsel %vm1446_vm6, %v1445_v26, %v1430_v35 }
 0x8e7   :  { %v1449_v19 = vsel %vm1448_vm7, %v1447_v29, %v1434_v4 }
 0x8ec   :  { %v1438_v52 = vpop.permute.xlu0 %1437 }
 0x8ed   :  { %v1451_v56 = vsel %vm1450_vm9, %v1449_v19, %v1438_v52 }
 0x8ee   :  { %1676 = vmatmul.msk.f32.vlgmr.msra.gmra.mxu1 %vm881_vm11, %v1451_v56  ;;  %vm1540_vm11 = vcmask 253952  }
 0x96b   :  { %v1523_v43 = vpop.f32.mrf.mxu1 }
 0x96c   :  { %v1526_v61 = vmul.f32 0.125, %v1523_v43 }
 0x96e   :  { %v1530_v63 = vadd.f32 %v1817_v42, %v1526_v61 }
 0x970   :  { %v1532_v38 = vmul.f32 1.442695, %v1530_v63  ;;  %vm1531_vm8 = vcmp.gt.f32.partialorder %v1530_v63, 0.0 }
 0x972   :  { %1918 = vpow2.f32 %v1532_v38 }
 0x978   :  { %v1919_v20 = vpop.eup %1918 }
 0x979   :  { %v1677_v11 = vadd.f32 -1.0, %v1919_v20 }
 0x97b   :  { %v1535_v33 = vsel %vm1531_vm8, %v1530_v63, %v1677_v11 }
 0x97c   :  { %1536 = vst.msk [vmem:[#allocation2] sm:$0xff] %vm152_vm1, %v1535_v33 }
 0x983   :  { %v1544_v57 = vld [vmem:[%s1543_s7] sm:$0x1] }
 0x984   :  { %v1552_v2 = vld [vmem:[%s1551_s21] sm:$0x1]  ;;  %1545 = vst.msk [vmem:[#allocation4] sm:$0x1] %vm1540_vm11, %v1544_v57 }
 0x985   :  { %v1560_v62 = vld [vmem:[%s1559_s12] sm:$0x1]  ;;  %1553 = vst.msk [vmem:[#allocation4 + $0x1] sm:$0x1] %vm1540_vm11, %v1552_v2 }
 0x986   :  { %v1539_v45 = vld [vmem:[%s1538_s30] sm:$0x1]  ;;  %1561 = vst.msk [vmem:[#allocation4 + $0x2] sm:$0x1] %vm1540_vm11, %v1560_v62 }
 0x987   :  { %v1548_v12 = vld [vmem:[%s1547_s16] sm:$0x1]  ;;  %1541 = vst.msk [vmem:[#allocation3] sm:$0x1] %vm1540_vm11, %v1539_v45 }
 0x988   :  { %v1556_v28 = vld [vmem:[%s1555_s23] sm:$0x1]  ;;  %1549 = vst.msk [vmem:[#allocation3 + $0x1] sm:$0x1] %vm1540_vm11, %v1548_v12 }
 0x989   :  { %1557 = vst.msk [vmem:[#allocation3 + $0x2] sm:$0x1] %vm1540_vm11, %v1556_v28 }
 0x98d   :  { %v1567_v54 = vld [vmem:[#allocation4] sm:$0x7] }
 0x98e   :  { %1682 = vmatmul.msk.f32.vlgmr.msrb.gmra.mxu2 %vm152_vm1, %v1567_v54 }
 0x990   :  { %v1562_v5 = vld [vmem:[#allocation3] sm:$0x7] }
 0x996   :  { %1683 = vmatmul.msk.f32.vlgmr.msra.gmra.mxu2 %vm152_vm1, %v1562_v5 }
 0xa11   :  { %v1592_v59 = vpop.f32.mrf.mxu2 }
 0xa19   :  { %v1615_v58 = vpop.f32.mrf.mxu2 }
 0xa1a   :  { %v1616_v3 = vadd.f32 %v1615_v58, %v1592_v59 }
 0xa1c   :  { %v1619_v50 = vmul.f32 1.442695, %v1616_v3  ;;  %vm1618_vm5 = vcmp.gt.f32.partialorder %v1616_v3, 0.0 }
 0xa1e   :  { %1920 = vpow2.f32 %v1619_v50 }
 0xa24   :  { %v1921_v16 = vpop.eup %1920 }
 0xa25   :  { %v1684_v15 = vadd.f32 -1.0, %v1921_v16 }
 0xa27   :  { %v1622_v32 = vsel %vm1618_vm5, %v1616_v3, %v1684_v15 }
 0xa28   :  { %1685 = vmatmul.msk.f32.vlgmr.msrb.gmra.mxu1 %vm152_vm1, %v1622_v32 }
 0xaa5   :  { %v1647_v22 = vpop.f32.mrf.mxu1 }
 0xaa6   :  { %1651 = vst.msk [vmem:[%s3117_s15] sm:$0x7] %vm1650_vm10, %v1647_v22 }
 0xaa7   :  { %1656 = vsyncpa [#allocation6], 1 }
 0xaa8   :  { %1657 = vsyncpa [#allocation8], 1 }

</bundles_post_ra>
